<compile_context>
chip_gen: v6e
topology: v6e:2x2x1
jax: 0.10.0
libtpu: 0.0.40
codegen_flags: <defaults>
</compile_context>

<pallas_src>
import functools
import math

import jax
import jax.numpy as jnp
from jax.experimental import pallas as pl


# ----------------------------------------------------------------------------
# Single fused kernel:  out = LN(t2 + FFN(t2)),
#   t2 = LN(t1 + EA(t1, src)),  t1 = LN(trg + SA(trg, trg))
# ----------------------------------------------------------------------------
def _decoder_layer_kernel(trg_ref, src_ref, tbias_ref, sbias_ref,
                          wqkv_sa_ref, bqkv_sa_ref, wo_sa_ref, bo_sa_ref,
                          wq_ea_ref, bq_ea_ref, wkv_ea_ref, bkv_ea_ref,
                          wo_ea_ref, bo_ea_ref,
                          w1_ref, b1_ref, w2_ref, b2_ref,
                          g_ref, beta_ref, o_ref,
                          *, n_batch, n_heads, head_dim, eps):
    B, nH, Dh = n_batch, n_heads, head_dim

    trg = trg_ref[...]                       # (B*Tq, H) f32
    src = src_ref[...]                       # (B*Tk, H) f32
    Tq = trg.shape[0] // B
    Tk = src.shape[0] // B
    H = trg.shape[1]

    g = g_ref[...]                           # (1, H) f32
    beta = beta_ref[...]                     # (1, H) f32

    def layer_norm(x):                       # rows independent, f32 math
        mean = jnp.mean(x, axis=-1, keepdims=True)
        xc = x - mean
        var = jnp.mean(xc * xc, axis=-1, keepdims=True)
        return xc * jax.lax.rsqrt(var + eps) * g + beta

    def sdpa_out(q, k, v, bias, wo3, bo):
        # q: (nH,Tq,Dh) f32 (scale pre-folded), k/v: (nH,Tk,Dh) f32,
        # bias: (Tq,Tk) f32 additive, wo3: (nH,Dh,H) bf16, bo: (1,H) f32.
        s = jnp.einsum("hqd,hkd->hqk",
                       q.astype(jnp.bfloat16), k.astype(jnp.bfloat16),
                       preferred_element_type=jnp.float32) + bias[None]
        s = s - jnp.max(s, axis=-1, keepdims=True)
        p = jnp.exp(s)
        p = p * pl.reciprocal(jnp.sum(p, axis=-1, keepdims=True), approx=True)
        ctx = jnp.einsum("hqk,hkd->hqd",
                         p.astype(jnp.bfloat16), v.astype(jnp.bfloat16),
                         preferred_element_type=jnp.float32)
        yh = jnp.einsum("hqd,hdf->hqf", ctx.astype(jnp.bfloat16), wo3,
                        preferred_element_type=jnp.float32)
        return jnp.sum(yh, axis=0) + bo      # (Tq, H) f32

    # ---- 1) masked self-attention + residual + LayerNorm --------------------
    wqkv_sa = wqkv_sa_ref[...]               # (nH, H, 3*Dh) bf16
    bqkv_sa = bqkv_sa_ref[...]               # (nH, 1, 3*Dh) f32
    wo_sa = wo_sa_ref[...]                   # (nH, Dh, H)   bf16
    bo_sa = bo_sa_ref[...]                   # (1, H)        f32
    rows = []
    for b in range(B):                       # tiny unrolled batch loop
        x_b = trg[b * Tq:(b + 1) * Tq]                          # (Tq, H)
        x3 = jnp.broadcast_to(x_b.astype(jnp.bfloat16)[None], (nH, Tq, H))
        qkv = jnp.einsum("htc,hcd->htd", x3, wqkv_sa,
                         preferred_element_type=jnp.float32) + bqkv_sa
        rows.append(sdpa_out(qkv[..., :Dh], qkv[..., Dh:2 * Dh],
                             qkv[..., 2 * Dh:], tbias_ref[b], wo_sa, bo_sa))
    t1 = layer_norm(trg + jnp.concatenate(rows, axis=0))

    # ---- 2) encoder (cross) attention + residual + LayerNorm ----------------
    wq_ea = wq_ea_ref[...]                   # (nH, H, Dh)   bf16
    bq_ea = bq_ea_ref[...]                   # (nH, 1, Dh)   f32
    wkv_ea = wkv_ea_ref[...]                 # (nH, H, 2*Dh) bf16
    bkv_ea = bkv_ea_ref[...]                 # (nH, 1, 2*Dh) f32
    wo_ea = wo_ea_ref[...]
    bo_ea = bo_ea_ref[...]
    rows = []
    for b in range(B):
        xq3 = jnp.broadcast_to(
            t1[b * Tq:(b + 1) * Tq].astype(jnp.bfloat16)[None], (nH, Tq, H))
        xk3 = jnp.broadcast_to(
            src[b * Tk:(b + 1) * Tk].astype(jnp.bfloat16)[None], (nH, Tk, H))
        q = jnp.einsum("hqc,hcd->hqd", xq3, wq_ea,
                       preferred_element_type=jnp.float32) + bq_ea
        kv = jnp.einsum("hkc,hcd->hkd", xk3, wkv_ea,
                        preferred_element_type=jnp.float32) + bkv_ea
        rows.append(sdpa_out(q, kv[..., :Dh], kv[..., Dh:],
                             sbias_ref[b], wo_ea, bo_ea))
    t2 = layer_norm(t1 + jnp.concatenate(rows, axis=0))

    # ---- 3) position-wise feed-forward + residual + LayerNorm ---------------
    h1 = jnp.dot(t2.astype(jnp.bfloat16), w1_ref[...],
                 preferred_element_type=jnp.float32) + b1_ref[...]
    h1 = jnp.maximum(h1, 0.0)
    y = jnp.dot(h1.astype(jnp.bfloat16), w2_ref[...],
                preferred_element_type=jnp.float32) + b2_ref[...]
    o_ref[...] = layer_norm(t2 + y).astype(o_ref.dtype)


# ----------------------------------------------------------------------------
# Wrapper: one pallas_call, single grid step, full arrays resident in VMEM.
# ----------------------------------------------------------------------------
def _make_additive_bias(mask, Tq, Tk):
    """mask broadcastable to (B,1,Tq,Tk); nonzero = attend. Returns (B,Tq,Tk)."""
    m = jnp.broadcast_to(mask, (mask.shape[0], 1, Tq, Tk))[:, 0]
    return jnp.where(m == 0, jnp.float32(-1e10), jnp.float32(0.0))


def attn_decoder_layer(trg, src, trg_mask, src_mask, params, n_heads):
    B, Tq, H = trg.shape
    Tk = src.shape[1]
    trg_bias = _make_additive_bias(trg_mask, Tq, Tq)
    src_bias = _make_additive_bias(src_mask, Tq, Tk)

    kernel = functools.partial(_decoder_layer_kernel, n_batch=B,
                               n_heads=n_heads, head_dim=H // n_heads,
                               eps=1e-5)
    out = pl.pallas_call(
        kernel,
        out_shape=jax.ShapeDtypeStruct((B * Tq, H), trg.dtype),
    )(
        trg.reshape(B * Tq, H), src.reshape(B * Tk, H), trg_bias, src_bias,
        params["sa"]["wqkv"], params["sa"]["bqkv"],
        params["sa"]["wo"], params["sa"]["bo"],
        params["ea"]["wq"], params["ea"]["bq"],
        params["ea"]["wkv"], params["ea"]["bkv"],
        params["ea"]["wo"], params["ea"]["bo"],
        params["pf"]["w1"], params["pf"]["b1"],
        params["pf"]["w2"], params["pf"]["b2"],
        params["ln_g"], params["ln_b"],
    )
    return out.reshape(B, Tq, H)


# ----------------------------------------------------------------------------
# Parameters: torch-like f32 init, then kernel-ready prep (head-major packing,
# scale folding, fused QKV / KV, bf16 weight cast, broadcast-ready biases).
# ----------------------------------------------------------------------------
def init_params(key, hid_dim, pf_dim):
    def dense(k, din, dout):
        kw, kb = jax.random.split(k)
        w = jax.random.normal(kw, (din, dout), jnp.float32) * 0.02
        b = jax.random.normal(kb, (dout,), jnp.float32) * 0.01
        return w, b

    keys = jax.random.split(key, 12)
    params = {"ln_g": jnp.ones((hid_dim,), jnp.float32),
              "ln_b": jnp.zeros((hid_dim,), jnp.float32)}
    for name, ks in (("sa", keys[0:4]), ("ea", keys[4:8])):
        wq, bq = dense(ks[0], hid_dim, hid_dim)
        wk, bk = dense(ks[1], hid_dim, hid_dim)
        wv, bv = dense(ks[2], hid_dim, hid_dim)
        wo, bo = dense(ks[3], hid_dim, hid_dim)
        params[name] = dict(wq=wq, bq=bq, wk=wk, bk=bk,
                            wv=wv, bv=bv, wo=wo, bo=bo)
    w1, b1 = dense(keys[8], hid_dim, pf_dim)
    w2, b2 = dense(keys[9], pf_dim, hid_dim)
    params["pf"] = dict(w1=w1, b1=b1, w2=w2, b2=b2)
    return params


def prepare_params(raw, n_heads):
    H = raw["sa"]["wq"].shape[0]
    Dh = H // n_heads
    scale = 1.0 / math.sqrt(Dh)

    def head_major(w):                       # (H, H) -> (nH, H, Dh)
        return jnp.transpose(w.reshape(H, n_heads, Dh), (1, 0, 2))

    def head_bias(b):                        # (H,)   -> (nH, 1, Dh)
        return b.reshape(n_heads, 1, Dh)

    sa, ea, pf = raw["sa"], raw["ea"], raw["pf"]
    PF = pf["w1"].shape[1]

    sa_p = dict(
        wqkv=jnp.concatenate([head_major(sa["wq"] * scale),
                              head_major(sa["wk"]),
                              head_major(sa["wv"])], axis=-1
                             ).astype(jnp.bfloat16),          # (nH, H, 3Dh)
        bqkv=jnp.concatenate([head_bias(sa["bq"] * scale),
                              head_bias(sa["bk"]),
                              head_bias(sa["bv"])], axis=-1
                             ).astype(jnp.float32),           # (nH, 1, 3Dh)
        wo=sa["wo"].reshape(n_heads, Dh, H).astype(jnp.bfloat16),
        bo=sa["bo"].reshape(1, H).astype(jnp.float32),
    )
    ea_p = dict(
        wq=head_major(ea["wq"] * scale).astype(jnp.bfloat16),  # (nH, H, Dh)
        bq=head_bias(ea["bq"] * scale).astype(jnp.float32),
        wkv=jnp.concatenate([head_major(ea["wk"]),
                             head_major(ea["wv"])], axis=-1
                            ).astype(jnp.bfloat16),            # (nH, H, 2Dh)
        bkv=jnp.concatenate([head_bias(ea["bk"]),
                             head_bias(ea["bv"])], axis=-1
                            ).astype(jnp.float32),
        wo=ea["wo"].reshape(n_heads, Dh, H).astype(jnp.bfloat16),
        bo=ea["bo"].reshape(1, H).astype(jnp.float32),
    )
    return dict(
        ln_g=raw["ln_g"].reshape(1, H).astype(jnp.float32),
        ln_b=raw["ln_b"].reshape(1, H).astype(jnp.float32),
        sa=sa_p, ea=ea_p,
        pf=dict(w1=pf["w1"].astype(jnp.bfloat16),
                b1=pf["b1"].reshape(1, PF).astype(jnp.float32),
                w2=pf["w2"].astype(jnp.bfloat16),
                b2=pf["b2"].reshape(1, H).astype(jnp.float32)),
    )


# ----------------------------------------------------------------------------
# Pure-JAX f32 reference (mirrors the PyTorch module, eval mode)
# ----------------------------------------------------------------------------
def reference_layer(trg, src, trg_mask, src_mask, raw, n_heads):
    def mha(xq, xkv, mask, p):
        B, Tq, H = xq.shape
        Tk = xkv.shape[1]
        Dh = H // n_heads
        q = (xq @ p["wq"] + p["bq"]).reshape(B, Tq, n_heads, Dh).transpose(0, 2, 1, 3)
        k = (xkv @ p["wk"] + p["bk"]).reshape(B, Tk, n_heads, Dh).transpose(0, 2, 1, 3)
        v = (xkv @ p["wv"] + p["bv"]).reshape(B, Tk, n_heads, Dh).transpose(0, 2, 1, 3)
        s = jnp.einsum("bhqd,bhkd->bhqk", q, k) / math.sqrt(Dh)
        s = jnp.where(mask == 0, jnp.float32(-1e10), s)
        a = jax.nn.softmax(s, axis=-1)
        o = jnp.einsum("bhqk,bhkd->bhqd", a, v).transpose(0, 2, 1, 3).reshape(B, Tq, H)
        return o @ p["wo"] + p["bo"]

    def ln(x):
        mean = jnp.mean(x, -1, keepdims=True)
        var = jnp.mean((x - mean) ** 2, -1, keepdims=True)
        return (x - mean) / jnp.sqrt(var + 1e-5) * raw["ln_g"] + raw["ln_b"]

    t = ln(trg + mha(trg, trg, trg_mask, raw["sa"]))
    t = ln(t + mha(t, src, src_mask, raw["ea"]))
    ff = jnp.maximum(t @ raw["pf"]["w1"] + raw["pf"]["b1"], 0.0) \
        @ raw["pf"]["w2"] + raw["pf"]["b2"]
    return ln(t + ff)


if __name__ == "__main__":
    B, TRG_LEN, SRC_LEN = 2, 8, 8
    HID, N_HEADS, PF_DIM = 32, 4, 64

    key = jax.random.PRNGKey(0)
    k_trg, k_src, k_par = jax.random.split(key, 3)

    trg = jax.random.normal(k_trg, (B, TRG_LEN, HID), jnp.float32)
    src = jax.random.normal(k_src, (B, SRC_LEN, HID), jnp.float32)

    # causal target mask [B, 1, Tq, Tq]; full source mask [B, 1, 1, Tk]
    trg_mask = jnp.tril(jnp.ones((TRG_LEN, TRG_LEN), jnp.float32))[None, None]
    trg_mask = jnp.broadcast_to(trg_mask, (B, 1, TRG_LEN, TRG_LEN))
    src_mask = jnp.ones((B, 1, 1, SRC_LEN), jnp.float32)

    raw_params = init_params(k_par, HID, PF_DIM)
    params = prepare_params(raw_params, N_HEADS)

    fwd = jax.jit(functools.partial(attn_decoder_layer, n_heads=N_HEADS))
    out = jax.block_until_ready(fwd(trg, src, trg_mask, src_mask, params))

    ref = reference_layer(trg, src, trg_mask, src_mask, raw_params, N_HEADS)
    err = float(jnp.max(jnp.abs(out - ref)))

    assert out.shape == (B, TRG_LEN, HID)
    assert bool(jnp.all(jnp.isfinite(out)))
    assert err < 0.1, f"mismatch vs f32 reference: max abs err = {err}"
    print("KERNEL_OK")
</pallas_src>

<mosaic_0001>
module attributes {stable_mosaic.version = 11 : i64} {
  func.func @_decoder_layer_kernel(%arg0: memref<16x32xf32, #tpu.memory_space<vmem>>, %arg1: memref<16x32xf32, #tpu.memory_space<vmem>>, %arg2: memref<2x8x8xf32, #tpu.memory_space<vmem>>, %arg3: memref<2x8x8xf32, #tpu.memory_space<vmem>>, %arg4: memref<4x32x24xbf16, #tpu.memory_space<vmem>>, %arg5: memref<4x1x24xf32, #tpu.memory_space<vmem>>, %arg6: memref<4x8x32xbf16, #tpu.memory_space<vmem>>, %arg7: memref<1x32xf32, #tpu.memory_space<vmem>>, %arg8: memref<4x32x8xbf16, #tpu.memory_space<vmem>>, %arg9: memref<4x1x8xf32, #tpu.memory_space<vmem>>, %arg10: memref<4x32x16xbf16, #tpu.memory_space<vmem>>, %arg11: memref<4x1x16xf32, #tpu.memory_space<vmem>>, %arg12: memref<4x8x32xbf16, #tpu.memory_space<vmem>>, %arg13: memref<1x32xf32, #tpu.memory_space<vmem>>, %arg14: memref<32x64xbf16, #tpu.memory_space<vmem>>, %arg15: memref<1x64xf32, #tpu.memory_space<vmem>>, %arg16: memref<64x32xbf16, #tpu.memory_space<vmem>>, %arg17: memref<1x32xf32, #tpu.memory_space<vmem>>, %arg18: memref<1x32xf32, #tpu.memory_space<vmem>>, %arg19: memref<1x32xf32, #tpu.memory_space<vmem>>, %arg20: memref<16x32xf32, #tpu.memory_space<vmem>>) attributes {dimension_semantics = [], scalar_prefetch = 0 : i64, scratch_operands = 0 : i64, tpu.core_type = #tpu.core_type<tc>} {
    %c0 = arith.constant 0 : index
    %c0_0 = arith.constant 0 : index
    %0 = vector.load %arg0[%c0, %c0_0] : memref<16x32xf32, #tpu.memory_space<vmem>>, vector<16x32xf32>
    %c0_1 = arith.constant 0 : index
    %c0_2 = arith.constant 0 : index
    %1 = vector.load %arg1[%c0_1, %c0_2] : memref<16x32xf32, #tpu.memory_space<vmem>>, vector<16x32xf32>
    %c0_3 = arith.constant 0 : index
    %c0_4 = arith.constant 0 : index
    %2 = vector.load %arg18[%c0_3, %c0_4] : memref<1x32xf32, #tpu.memory_space<vmem>>, vector<1x32xf32>
    %c0_5 = arith.constant 0 : index
    %c0_6 = arith.constant 0 : index
    %3 = vector.load %arg19[%c0_5, %c0_6] : memref<1x32xf32, #tpu.memory_space<vmem>>, vector<1x32xf32>
    %c0_7 = arith.constant 0 : index
    %c0_8 = arith.constant 0 : index
    %c0_9 = arith.constant 0 : index
    %4 = vector.load %arg4[%c0_7, %c0_8, %c0_9] : memref<4x32x24xbf16, #tpu.memory_space<vmem>>, vector<4x32x24xbf16>
    %c0_10 = arith.constant 0 : index
    %c0_11 = arith.constant 0 : index
    %c0_12 = arith.constant 0 : index
    %5 = vector.load %arg5[%c0_10, %c0_11, %c0_12] : memref<4x1x24xf32, #tpu.memory_space<vmem>>, vector<4x1x24xf32>
    %c0_13 = arith.constant 0 : index
    %c0_14 = arith.constant 0 : index
    %c0_15 = arith.constant 0 : index
    %6 = vector.load %arg6[%c0_13, %c0_14, %c0_15] : memref<4x8x32xbf16, #tpu.memory_space<vmem>>, vector<4x8x32xbf16>
    %c0_16 = arith.constant 0 : index
    %c0_17 = arith.constant 0 : index
    %7 = vector.load %arg7[%c0_16, %c0_17] : memref<1x32xf32, #tpu.memory_space<vmem>>, vector<1x32xf32>
    %8 = vector.extract_strided_slice %0 {offsets = [0, 0], sizes = [8, 32], strides = [1, 1]} : vector<16x32xf32> to vector<8x32xf32>
    %9 = arith.truncf %8 : vector<8x32xf32> to vector<8x32xbf16>
    %10 = vector.shape_cast %9 : vector<8x32xbf16> to vector<1x8x32xbf16>
    %11 = vector.shape_cast %10 : vector<1x8x32xbf16> to vector<1x8x32xbf16>
    %12 = vector.broadcast %11 : vector<1x8x32xbf16> to vector<4x8x32xbf16>
    "tpu.trace_start"() <{level = 10 : i32, message = "htc,hcd->htd"}> : () -> ()
    %cst = arith.constant dense<0.000000e+00> : vector<4x8x24xf32>
    %13 = tpu.matmul %12, %4, %cst {dimension_numbers = #tpu.dot_dimension_numbers<[2], [1], [1], [2], [0, 0, 0, 1, 1, 2], [0], [0]>} : vector<4x8x32xbf16>, vector<4x32x24xbf16>, vector<4x8x24xf32> -> vector<4x8x24xf32>
    "tpu.trace_stop"() : () -> ()
    %14 = vector.broadcast %5 : vector<4x1x24xf32> to vector<4x8x24xf32>
    %15 = arith.addf %13, %14 : vector<4x8x24xf32>
    %16 = vector.extract_strided_slice %15 {offsets = [0, 0, 0], sizes = [4, 8, 8], strides = [1, 1, 1]} : vector<4x8x24xf32> to vector<4x8x8xf32>
    %17 = vector.extract_strided_slice %15 {offsets = [0, 0, 8], sizes = [4, 8, 8], strides = [1, 1, 1]} : vector<4x8x24xf32> to vector<4x8x8xf32>
    %18 = vector.extract_strided_slice %15 {offsets = [0, 0, 16], sizes = [4, 8, 8], strides = [1, 1, 1]} : vector<4x8x24xf32> to vector<4x8x8xf32>
    %c0_18 = arith.constant 0 : index
    %c0_19 = arith.constant 0 : index
    %c0_20 = arith.constant 0 : index
    %19 = vector.load %arg2[%c0_18, %c0_19, %c0_20] : memref<2x8x8xf32, #tpu.memory_space<vmem>>, vector<1x8x8xf32>
    %20 = vector.shape_cast %19 : vector<1x8x8xf32> to vector<8x8xf32>
    %21 = arith.truncf %16 : vector<4x8x8xf32> to vector<4x8x8xbf16>
    %22 = arith.truncf %17 : vector<4x8x8xf32> to vector<4x8x8xbf16>
    "tpu.trace_start"() <{level = 10 : i32, message = "hqd,hkd->hqk"}> : () -> ()
    %cst_21 = arith.constant dense<0.000000e+00> : vector<4x8x8xf32>
    %23 = tpu.matmul %21, %22, %cst_21 {dimension_numbers = #tpu.dot_dimension_numbers<[2], [2], [1], [1], [0, 0, 0, 1, 1, 1], [0], [0]>} : vector<4x8x8xbf16>, vector<4x8x8xbf16>, vector<4x8x8xf32> -> vector<4x8x8xf32>
    "tpu.trace_stop"() : () -> ()
    %24 = vector.shape_cast %20 : vector<8x8xf32> to vector<1x8x8xf32>
    %25 = vector.broadcast %24 : vector<1x8x8xf32> to vector<4x8x8xf32>
    %26 = arith.addf %23, %25 : vector<4x8x8xf32>
    %cst_22 = arith.constant dense<0xFF800000> : vector<4x8xf32>
    %27 = vector.multi_reduction <maximumf>, %26, %cst_22 [2] : vector<4x8x8xf32> to vector<4x8xf32>
    %28 = vector.shape_cast %27 : vector<4x8xf32> to vector<4x8x1xf32>
    %29 = vector.broadcast %28 : vector<4x8x1xf32> to vector<4x8x8xf32>
    %30 = arith.subf %26, %29 : vector<4x8x8xf32>
    %31 = math.exp %30 : vector<4x8x8xf32>
    %cst_23 = arith.constant dense<0.000000e+00> : vector<4x8xf32>
    %32 = vector.multi_reduction <add>, %31, %cst_23 [2] : vector<4x8x8xf32> to vector<4x8xf32>
    %33 = vector.shape_cast %32 : vector<4x8xf32> to vector<4x8x1xf32>
    %34 = tpu.reciprocal %33 {approx = true} : vector<4x8x1xf32> -> vector<4x8x1xf32>
    %35 = vector.broadcast %34 : vector<4x8x1xf32> to vector<4x8x8xf32>
    %36 = arith.mulf %31, %35 : vector<4x8x8xf32>
    %37 = arith.truncf %36 : vector<4x8x8xf32> to vector<4x8x8xbf16>
    %38 = arith.truncf %18 : vector<4x8x8xf32> to vector<4x8x8xbf16>
    "tpu.trace_start"() <{level = 10 : i32, message = "hqk,hkd->hqd"}> : () -> ()
    %cst_24 = arith.constant dense<0.000000e+00> : vector<4x8x8xf32>
    %39 = tpu.matmul %37, %38, %cst_24 {dimension_numbers = #tpu.dot_dimension_numbers<[2], [1], [1], [2], [0, 0, 0, 1, 1, 2], [0], [0]>} : vector<4x8x8xbf16>, vector<4x8x8xbf16>, vector<4x8x8xf32> -> vector<4x8x8xf32>
    "tpu.trace_stop"() : () -> ()
    %40 = arith.truncf %39 : vector<4x8x8xf32> to vector<4x8x8xbf16>
    "tpu.trace_start"() <{level = 10 : i32, message = "hqd,hdf->hqf"}> : () -> ()
    %cst_25 = arith.constant dense<0.000000e+00> : vector<4x8x32xf32>
    %41 = tpu.matmul %40, %6, %cst_25 {dimension_numbers = #tpu.dot_dimension_numbers<[2], [1], [1], [2], [0, 0, 0, 1, 1, 2], [0], [0]>} : vector<4x8x8xbf16>, vector<4x8x32xbf16>, vector<4x8x32xf32> -> vector<4x8x32xf32>
    "tpu.trace_stop"() : () -> ()
    %cst_26 = arith.constant dense<0.000000e+00> : vector<8x32xf32>
    %42 = vector.multi_reduction <add>, %41, %cst_26 [0] : vector<4x8x32xf32> to vector<8x32xf32>
    %43 = vector.broadcast %7 : vector<1x32xf32> to vector<8x32xf32>
    %44 = arith.addf %42, %43 : vector<8x32xf32>
    %45 = vector.extract_strided_slice %0 {offsets = [8, 0], sizes = [8, 32], strides = [1, 1]} : vector<16x32xf32> to vector<8x32xf32>
    %46 = arith.truncf %45 : vector<8x32xf32> to vector<8x32xbf16>
    %47 = vector.shape_cast %46 : vector<8x32xbf16> to vector<1x8x32xbf16>
    %48 = vector.shape_cast %47 : vector<1x8x32xbf16> to vector<1x8x32xbf16>
    %49 = vector.broadcast %48 : vector<1x8x32xbf16> to vector<4x8x32xbf16>
    "tpu.trace_start"() <{level = 10 : i32, message = "htc,hcd->htd"}> : () -> ()
    %cst_27 = arith.constant dense<0.000000e+00> : vector<4x8x24xf32>
    %50 = tpu.matmul %49, %4, %cst_27 {dimension_numbers = #tpu.dot_dimension_numbers<[2], [1], [1], [2], [0, 0, 0, 1, 1, 2], [0], [0]>} : vector<4x8x32xbf16>, vector<4x32x24xbf16>, vector<4x8x24xf32> -> vector<4x8x24xf32>
    "tpu.trace_stop"() : () -> ()
    %51 = vector.broadcast %5 : vector<4x1x24xf32> to vector<4x8x24xf32>
    %52 = arith.addf %50, %51 : vector<4x8x24xf32>
    %53 = vector.extract_strided_slice %52 {offsets = [0, 0, 0], sizes = [4, 8, 8], strides = [1, 1, 1]} : vector<4x8x24xf32> to vector<4x8x8xf32>
    %54 = vector.extract_strided_slice %52 {offsets = [0, 0, 8], sizes = [4, 8, 8], strides = [1, 1, 1]} : vector<4x8x24xf32> to vector<4x8x8xf32>
    %55 = vector.extract_strided_slice %52 {offsets = [0, 0, 16], sizes = [4, 8, 8], strides = [1, 1, 1]} : vector<4x8x24xf32> to vector<4x8x8xf32>
    %c1 = arith.constant 1 : index
    %c0_28 = arith.constant 0 : index
    %c0_29 = arith.constant 0 : index
    %56 = vector.load %arg2[%c1, %c0_28, %c0_29] : memref<2x8x8xf32, #tpu.memory_space<vmem>>, vector<1x8x8xf32>
    %57 = vector.shape_cast %56 : vector<1x8x8xf32> to vector<8x8xf32>
    %58 = arith.truncf %53 : vector<4x8x8xf32> to vector<4x8x8xbf16>
    %59 = arith.truncf %54 : vector<4x8x8xf32> to vector<4x8x8xbf16>
    "tpu.trace_start"() <{level = 10 : i32, message = "hqd,hkd->hqk"}> : () -> ()
    %cst_30 = arith.constant dense<0.000000e+00> : vector<4x8x8xf32>
    %60 = tpu.matmul %58, %59, %cst_30 {dimension_numbers = #tpu.dot_dimension_numbers<[2], [2], [1], [1], [0, 0, 0, 1, 1, 1], [0], [0]>} : vector<4x8x8xbf16>, vector<4x8x8xbf16>, vector<4x8x8xf32> -> vector<4x8x8xf32>
    "tpu.trace_stop"() : () -> ()
    %61 = vector.shape_cast %57 : vector<8x8xf32> to vector<1x8x8xf32>
    %62 = vector.broadcast %61 : vector<1x8x8xf32> to vector<4x8x8xf32>
    %63 = arith.addf %60, %62 : vector<4x8x8xf32>
    %cst_31 = arith.constant dense<0xFF800000> : vector<4x8xf32>
    %64 = vector.multi_reduction <maximumf>, %63, %cst_31 [2] : vector<4x8x8xf32> to vector<4x8xf32>
    %65 = vector.shape_cast %64 : vector<4x8xf32> to vector<4x8x1xf32>
    %66 = vector.broadcast %65 : vector<4x8x1xf32> to vector<4x8x8xf32>
    %67 = arith.subf %63, %66 : vector<4x8x8xf32>
    %68 = math.exp %67 : vector<4x8x8xf32>
    %cst_32 = arith.constant dense<0.000000e+00> : vector<4x8xf32>
    %69 = vector.multi_reduction <add>, %68, %cst_32 [2] : vector<4x8x8xf32> to vector<4x8xf32>
    %70 = vector.shape_cast %69 : vector<4x8xf32> to vector<4x8x1xf32>
    %71 = tpu.reciprocal %70 {approx = true} : vector<4x8x1xf32> -> vector<4x8x1xf32>
    %72 = vector.broadcast %71 : vector<4x8x1xf32> to vector<4x8x8xf32>
    %73 = arith.mulf %68, %72 : vector<4x8x8xf32>
    %74 = arith.truncf %73 : vector<4x8x8xf32> to vector<4x8x8xbf16>
    %75 = arith.truncf %55 : vector<4x8x8xf32> to vector<4x8x8xbf16>
    "tpu.trace_start"() <{level = 10 : i32, message = "hqk,hkd->hqd"}> : () -> ()
    %cst_33 = arith.constant dense<0.000000e+00> : vector<4x8x8xf32>
    %76 = tpu.matmul %74, %75, %cst_33 {dimension_numbers = #tpu.dot_dimension_numbers<[2], [1], [1], [2], [0, 0, 0, 1, 1, 2], [0], [0]>} : vector<4x8x8xbf16>, vector<4x8x8xbf16>, vector<4x8x8xf32> -> vector<4x8x8xf32>
    "tpu.trace_stop"() : () -> ()
    %77 = arith.truncf %76 : vector<4x8x8xf32> to vector<4x8x8xbf16>
    "tpu.trace_start"() <{level = 10 : i32, message = "hqd,hdf->hqf"}> : () -> ()
    %cst_34 = arith.constant dense<0.000000e+00> : vector<4x8x32xf32>
    %78 = tpu.matmul %77, %6, %cst_34 {dimension_numbers = #tpu.dot_dimension_numbers<[2], [1], [1], [2], [0, 0, 0, 1, 1, 2], [0], [0]>} : vector<4x8x8xbf16>, vector<4x8x32xbf16>, vector<4x8x32xf32> -> vector<4x8x32xf32>
    "tpu.trace_stop"() : () -> ()
    %cst_35 = arith.constant dense<0.000000e+00> : vector<8x32xf32>
    %79 = vector.multi_reduction <add>, %78, %cst_35 [0] : vector<4x8x32xf32> to vector<8x32xf32>
    %80 = vector.broadcast %7 : vector<1x32xf32> to vector<8x32xf32>
    %81 = arith.addf %79, %80 : vector<8x32xf32>
    %82 = tpu.concatenate %44, %81 in 0 : vector<8x32xf32>, vector<8x32xf32> -> vector<16x32xf32>
    %83 = arith.addf %0, %82 : vector<16x32xf32>
    %cst_36 = arith.constant dense<0.000000e+00> : vector<16xf32>
    %84 = vector.multi_reduction <add>, %83, %cst_36 [1] : vector<16x32xf32> to vector<16xf32>
    %85 = vector.shape_cast %84 : vector<16xf32> to vector<16x1xf32>
    %cst_37 = arith.constant 3.200000e+01 : f32
    %86 = vector.broadcast %cst_37 : f32 to vector<16x1xf32>
    %87 = arith.divf %85, %86 : vector<16x1xf32>
    %88 = vector.broadcast %87 : vector<16x1xf32> to vector<16x32xf32>
    %89 = arith.subf %83, %88 : vector<16x32xf32>
    %90 = arith.mulf %89, %89 : vector<16x32xf32>
    %cst_38 = arith.constant dense<0.000000e+00> : vector<16xf32>
    %91 = vector.multi_reduction <add>, %90, %cst_38 [1] : vector<16x32xf32> to vector<16xf32>
    %92 = vector.shape_cast %91 : vector<16xf32> to vector<16x1xf32>
    %cst_39 = arith.constant 3.200000e+01 : f32
    %93 = vector.broadcast %cst_39 : f32 to vector<16x1xf32>
    %94 = arith.divf %92, %93 : vector<16x1xf32>
    %cst_40 = arith.constant 9.99999974E-6 : f32
    %95 = vector.broadcast %cst_40 : f32 to vector<16x1xf32>
    %96 = arith.addf %94, %95 : vector<16x1xf32>
    %97 = math.rsqrt %96 : vector<16x1xf32>
    %98 = vector.broadcast %97 : vector<16x1xf32> to vector<16x32xf32>
    %99 = arith.mulf %89, %98 : vector<16x32xf32>
    %100 = vector.broadcast %2 : vector<1x32xf32> to vector<16x32xf32>
    %101 = arith.mulf %99, %100 : vector<16x32xf32>
    %102 = vector.broadcast %3 : vector<1x32xf32> to vector<16x32xf32>
    %103 = arith.addf %101, %102 : vector<16x32xf32>
    %c0_41 = arith.constant 0 : index
    %c0_42 = arith.constant 0 : index
    %c0_43 = arith.constant 0 : index
    %104 = vector.load %arg8[%c0_41, %c0_42, %c0_43] : memref<4x32x8xbf16, #tpu.memory_space<vmem>>, vector<4x32x8xbf16>
    %c0_44 = arith.constant 0 : index
    %c0_45 = arith.constant 0 : index
    %c0_46 = arith.constant 0 : index
    %105 = vector.load %arg9[%c0_44, %c0_45, %c0_46] : memref<4x1x8xf32, #tpu.memory_space<vmem>>, vector<4x1x8xf32>
    %c0_47 = arith.constant 0 : index
    %c0_48 = arith.constant 0 : index
    %c0_49 = arith.constant 0 : index
    %106 = vector.load %arg10[%c0_47, %c0_48, %c0_49] : memref<4x32x16xbf16, #tpu.memory_space<vmem>>, vector<4x32x16xbf16>
    %c0_50 = arith.constant 0 : index
    %c0_51 = arith.constant 0 : index
    %c0_52 = arith.constant 0 : index
    %107 = vector.load %arg11[%c0_50, %c0_51, %c0_52] : memref<4x1x16xf32, #tpu.memory_space<vmem>>, vector<4x1x16xf32>
    %c0_53 = arith.constant 0 : index
    %c0_54 = arith.constant 0 : index
    %c0_55 = arith.constant 0 : index
    %108 = vector.load %arg12[%c0_53, %c0_54, %c0_55] : memref<4x8x32xbf16, #tpu.memory_space<vmem>>, vector<4x8x32xbf16>
    %c0_56 = arith.constant 0 : index
    %c0_57 = arith.constant 0 : index
    %109 = vector.load %arg13[%c0_56, %c0_57] : memref<1x32xf32, #tpu.memory_space<vmem>>, vector<1x32xf32>
    %110 = vector.extract_strided_slice %103 {offsets = [0, 0], sizes = [8, 32], strides = [1, 1]} : vector<16x32xf32> to vector<8x32xf32>
    %111 = arith.truncf %110 : vector<8x32xf32> to vector<8x32xbf16>
    %112 = vector.shape_cast %111 : vector<8x32xbf16> to vector<1x8x32xbf16>
    %113 = vector.shape_cast %112 : vector<1x8x32xbf16> to vector<1x8x32xbf16>
    %114 = vector.broadcast %113 : vector<1x8x32xbf16> to vector<4x8x32xbf16>
    %115 = vector.extract_strided_slice %1 {offsets = [0, 0], sizes = [8, 32], strides = [1, 1]} : vector<16x32xf32> to vector<8x32xf32>
    %116 = arith.truncf %115 : vector<8x32xf32> to vector<8x32xbf16>
    %117 = vector.shape_cast %116 : vector<8x32xbf16> to vector<1x8x32xbf16>
    %118 = vector.shape_cast %117 : vector<1x8x32xbf16> to vector<1x8x32xbf16>
    %119 = vector.broadcast %118 : vector<1x8x32xbf16> to vector<4x8x32xbf16>
    "tpu.trace_start"() <{level = 10 : i32, message = "hqc,hcd->hqd"}> : () -> ()
    %cst_58 = arith.constant dense<0.000000e+00> : vector<4x8x8xf32>
    %120 = tpu.matmul %114, %104, %cst_58 {dimension_numbers = #tpu.dot_dimension_numbers<[2], [1], [1], [2], [0, 0, 0, 1, 1, 2], [0], [0]>} : vector<4x8x32xbf16>, vector<4x32x8xbf16>, vector<4x8x8xf32> -> vector<4x8x8xf32>
    "tpu.trace_stop"() : () -> ()
    %121 = vector.broadcast %105 : vector<4x1x8xf32> to vector<4x8x8xf32>
    %122 = arith.addf %120, %121 : vector<4x8x8xf32>
    "tpu.trace_start"() <{level = 10 : i32, message = "hkc,hcd->hkd"}> : () -> ()
    %cst_59 = arith.constant dense<0.000000e+00> : vector<4x8x16xf32>
    %123 = tpu.matmul %119, %106, %cst_59 {dimension_numbers = #tpu.dot_dimension_numbers<[2], [1], [1], [2], [0, 0, 0, 1, 1, 2], [0], [0]>} : vector<4x8x32xbf16>, vector<4x32x16xbf16>, vector<4x8x16xf32> -> vector<4x8x16xf32>
    "tpu.trace_stop"() : () -> ()
    %124 = vector.broadcast %107 : vector<4x1x16xf32> to vector<4x8x16xf32>
    %125 = arith.addf %123, %124 : vector<4x8x16xf32>
    %126 = vector.extract_strided_slice %125 {offsets = [0, 0, 0], sizes = [4, 8, 8], strides = [1, 1, 1]} : vector<4x8x16xf32> to vector<4x8x8xf32>
    %127 = vector.extract_strided_slice %125 {offsets = [0, 0, 8], sizes = [4, 8, 8], strides = [1, 1, 1]} : vector<4x8x16xf32> to vector<4x8x8xf32>
    %c0_60 = arith.constant 0 : index
    %c0_61 = arith.constant 0 : index
    %c0_62 = arith.constant 0 : index
    %128 = vector.load %arg3[%c0_60, %c0_61, %c0_62] : memref<2x8x8xf32, #tpu.memory_space<vmem>>, vector<1x8x8xf32>
    %129 = vector.shape_cast %128 : vector<1x8x8xf32> to vector<8x8xf32>
    %130 = arith.truncf %122 : vector<4x8x8xf32> to vector<4x8x8xbf16>
    %131 = arith.truncf %126 : vector<4x8x8xf32> to vector<4x8x8xbf16>
    "tpu.trace_start"() <{level = 10 : i32, message = "hqd,hkd->hqk"}> : () -> ()
    %cst_63 = arith.constant dense<0.000000e+00> : vector<4x8x8xf32>
    %132 = tpu.matmul %130, %131, %cst_63 {dimension_numbers = #tpu.dot_dimension_numbers<[2], [2], [1], [1], [0, 0, 0, 1, 1, 1], [0], [0]>} : vector<4x8x8xbf16>, vector<4x8x8xbf16>, vector<4x8x8xf32> -> vector<4x8x8xf32>
    "tpu.trace_stop"() : () -> ()
    %133 = vector.shape_cast %129 : vector<8x8xf32> to vector<1x8x8xf32>
    %134 = vector.broadcast %133 : vector<1x8x8xf32> to vector<4x8x8xf32>
    %135 = arith.addf %132, %134 : vector<4x8x8xf32>
    %cst_64 = arith.constant dense<0xFF800000> : vector<4x8xf32>
    %136 = vector.multi_reduction <maximumf>, %135, %cst_64 [2] : vector<4x8x8xf32> to vector<4x8xf32>
    %137 = vector.shape_cast %136 : vector<4x8xf32> to vector<4x8x1xf32>
    %138 = vector.broadcast %137 : vector<4x8x1xf32> to vector<4x8x8xf32>
    %139 = arith.subf %135, %138 : vector<4x8x8xf32>
    %140 = math.exp %139 : vector<4x8x8xf32>
    %cst_65 = arith.constant dense<0.000000e+00> : vector<4x8xf32>
    %141 = vector.multi_reduction <add>, %140, %cst_65 [2] : vector<4x8x8xf32> to vector<4x8xf32>
    %142 = vector.shape_cast %141 : vector<4x8xf32> to vector<4x8x1xf32>
    %143 = tpu.reciprocal %142 {approx = true} : vector<4x8x1xf32> -> vector<4x8x1xf32>
    %144 = vector.broadcast %143 : vector<4x8x1xf32> to vector<4x8x8xf32>
    %145 = arith.mulf %140, %144 : vector<4x8x8xf32>
    %146 = arith.truncf %145 : vector<4x8x8xf32> to vector<4x8x8xbf16>
    %147 = arith.truncf %127 : vector<4x8x8xf32> to vector<4x8x8xbf16>
    "tpu.trace_start"() <{level = 10 : i32, message = "hqk,hkd->hqd"}> : () -> ()
    %cst_66 = arith.constant dense<0.000000e+00> : vector<4x8x8xf32>
    %148 = tpu.matmul %146, %147, %cst_66 {dimension_numbers = #tpu.dot_dimension_numbers<[2], [1], [1], [2], [0, 0, 0, 1, 1, 2], [0], [0]>} : vector<4x8x8xbf16>, vector<4x8x8xbf16>, vector<4x8x8xf32> -> vector<4x8x8xf32>
    "tpu.trace_stop"() : () -> ()
    %149 = arith.truncf %148 : vector<4x8x8xf32> to vector<4x8x8xbf16>
    "tpu.trace_start"() <{level = 10 : i32, message = "hqd,hdf->hqf"}> : () -> ()
    %cst_67 = arith.constant dense<0.000000e+00> : vector<4x8x32xf32>
    %150 = tpu.matmul %149, %108, %cst_67 {dimension_numbers = #tpu.dot_dimension_numbers<[2], [1], [1], [2], [0, 0, 0, 1, 1, 2], [0], [0]>} : vector<4x8x8xbf16>, vector<4x8x32xbf16>, vector<4x8x32xf32> -> vector<4x8x32xf32>
    "tpu.trace_stop"() : () -> ()
    %cst_68 = arith.constant dense<0.000000e+00> : vector<8x32xf32>
    %151 = vector.multi_reduction <add>, %150, %cst_68 [0] : vector<4x8x32xf32> to vector<8x32xf32>
    %152 = vector.broadcast %109 : vector<1x32xf32> to vector<8x32xf32>
    %153 = arith.addf %151, %152 : vector<8x32xf32>
    %154 = vector.extract_strided_slice %103 {offsets = [8, 0], sizes = [8, 32], strides = [1, 1]} : vector<16x32xf32> to vector<8x32xf32>
    %155 = arith.truncf %154 : vector<8x32xf32> to vector<8x32xbf16>
    %156 = vector.shape_cast %155 : vector<8x32xbf16> to vector<1x8x32xbf16>
    %157 = vector.shape_cast %156 : vector<1x8x32xbf16> to vector<1x8x32xbf16>
    %158 = vector.broadcast %157 : vector<1x8x32xbf16> to vector<4x8x32xbf16>
    %159 = vector.extract_strided_slice %1 {offsets = [8, 0], sizes = [8, 32], strides = [1, 1]} : vector<16x32xf32> to vector<8x32xf32>
    %160 = arith.truncf %159 : vector<8x32xf32> to vector<8x32xbf16>
    %161 = vector.shape_cast %160 : vector<8x32xbf16> to vector<1x8x32xbf16>
    %162 = vector.shape_cast %161 : vector<1x8x32xbf16> to vector<1x8x32xbf16>
    %163 = vector.broadcast %162 : vector<1x8x32xbf16> to vector<4x8x32xbf16>
    "tpu.trace_start"() <{level = 10 : i32, message = "hqc,hcd->hqd"}> : () -> ()
    %cst_69 = arith.constant dense<0.000000e+00> : vector<4x8x8xf32>
    %164 = tpu.matmul %158, %104, %cst_69 {dimension_numbers = #tpu.dot_dimension_numbers<[2], [1], [1], [2], [0, 0, 0, 1, 1, 2], [0], [0]>} : vector<4x8x32xbf16>, vector<4x32x8xbf16>, vector<4x8x8xf32> -> vector<4x8x8xf32>
    "tpu.trace_stop"() : () -> ()
    %165 = vector.broadcast %105 : vector<4x1x8xf32> to vector<4x8x8xf32>
    %166 = arith.addf %164, %165 : vector<4x8x8xf32>
    "tpu.trace_start"() <{level = 10 : i32, message = "hkc,hcd->hkd"}> : () -> ()
    %cst_70 = arith.constant dense<0.000000e+00> : vector<4x8x16xf32>
    %167 = tpu.matmul %163, %106, %cst_70 {dimension_numbers = #tpu.dot_dimension_numbers<[2], [1], [1], [2], [0, 0, 0, 1, 1, 2], [0], [0]>} : vector<4x8x32xbf16>, vector<4x32x16xbf16>, vector<4x8x16xf32> -> vector<4x8x16xf32>
    "tpu.trace_stop"() : () -> ()
    %168 = vector.broadcast %107 : vector<4x1x16xf32> to vector<4x8x16xf32>
    %169 = arith.addf %167, %168 : vector<4x8x16xf32>
    %170 = vector.extract_strided_slice %169 {offsets = [0, 0, 0], sizes = [4, 8, 8], strides = [1, 1, 1]} : vector<4x8x16xf32> to vector<4x8x8xf32>
    %171 = vector.extract_strided_slice %169 {offsets = [0, 0, 8], sizes = [4, 8, 8], strides = [1, 1, 1]} : vector<4x8x16xf32> to vector<4x8x8xf32>
    %c1_71 = arith.constant 1 : index
    %c0_72 = arith.constant 0 : index
    %c0_73 = arith.constant 0 : index
    %172 = vector.load %arg3[%c1_71, %c0_72, %c0_73] : memref<2x8x8xf32, #tpu.memory_space<vmem>>, vector<1x8x8xf32>
    %173 = vector.shape_cast %172 : vector<1x8x8xf32> to vector<8x8xf32>
    %174 = arith.truncf %166 : vector<4x8x8xf32> to vector<4x8x8xbf16>
    %175 = arith.truncf %170 : vector<4x8x8xf32> to vector<4x8x8xbf16>
    "tpu.trace_start"() <{level = 10 : i32, message = "hqd,hkd->hqk"}> : () -> ()
    %cst_74 = arith.constant dense<0.000000e+00> : vector<4x8x8xf32>
    %176 = tpu.matmul %174, %175, %cst_74 {dimension_numbers = #tpu.dot_dimension_numbers<[2], [2], [1], [1], [0, 0, 0, 1, 1, 1], [0], [0]>} : vector<4x8x8xbf16>, vector<4x8x8xbf16>, vector<4x8x8xf32> -> vector<4x8x8xf32>
    "tpu.trace_stop"() : () -> ()
    %177 = vector.shape_cast %173 : vector<8x8xf32> to vector<1x8x8xf32>
    %178 = vector.broadcast %177 : vector<1x8x8xf32> to vector<4x8x8xf32>
    %179 = arith.addf %176, %178 : vector<4x8x8xf32>
    %cst_75 = arith.constant dense<0xFF800000> : vector<4x8xf32>
    %180 = vector.multi_reduction <maximumf>, %179, %cst_75 [2] : vector<4x8x8xf32> to vector<4x8xf32>
    %181 = vector.shape_cast %180 : vector<4x8xf32> to vector<4x8x1xf32>
    %182 = vector.broadcast %181 : vector<4x8x1xf32> to vector<4x8x8xf32>
    %183 = arith.subf %179, %182 : vector<4x8x8xf32>
    %184 = math.exp %183 : vector<4x8x8xf32>
    %cst_76 = arith.constant dense<0.000000e+00> : vector<4x8xf32>
    %185 = vector.multi_reduction <add>, %184, %cst_76 [2] : vector<4x8x8xf32> to vector<4x8xf32>
    %186 = vector.shape_cast %185 : vector<4x8xf32> to vector<4x8x1xf32>
    %187 = tpu.reciprocal %186 {approx = true} : vector<4x8x1xf32> -> vector<4x8x1xf32>
    %188 = vector.broadcast %187 : vector<4x8x1xf32> to vector<4x8x8xf32>
    %189 = arith.mulf %184, %188 : vector<4x8x8xf32>
    %190 = arith.truncf %189 : vector<4x8x8xf32> to vector<4x8x8xbf16>
    %191 = arith.truncf %171 : vector<4x8x8xf32> to vector<4x8x8xbf16>
    "tpu.trace_start"() <{level = 10 : i32, message = "hqk,hkd->hqd"}> : () -> ()
    %cst_77 = arith.constant dense<0.000000e+00> : vector<4x8x8xf32>
    %192 = tpu.matmul %190, %191, %cst_77 {dimension_numbers = #tpu.dot_dimension_numbers<[2], [1], [1], [2], [0, 0, 0, 1, 1, 2], [0], [0]>} : vector<4x8x8xbf16>, vector<4x8x8xbf16>, vector<4x8x8xf32> -> vector<4x8x8xf32>
    "tpu.trace_stop"() : () -> ()
    %193 = arith.truncf %192 : vector<4x8x8xf32> to vector<4x8x8xbf16>
    "tpu.trace_start"() <{level = 10 : i32, message = "hqd,hdf->hqf"}> : () -> ()
    %cst_78 = arith.constant dense<0.000000e+00> : vector<4x8x32xf32>
    %194 = tpu.matmul %193, %108, %cst_78 {dimension_numbers = #tpu.dot_dimension_numbers<[2], [1], [1], [2], [0, 0, 0, 1, 1, 2], [0], [0]>} : vector<4x8x8xbf16>, vector<4x8x32xbf16>, vector<4x8x32xf32> -> vector<4x8x32xf32>
    "tpu.trace_stop"() : () -> ()
    %cst_79 = arith.constant dense<0.000000e+00> : vector<8x32xf32>
    %195 = vector.multi_reduction <add>, %194, %cst_79 [0] : vector<4x8x32xf32> to vector<8x32xf32>
    %196 = vector.broadcast %109 : vector<1x32xf32> to vector<8x32xf32>
    %197 = arith.addf %195, %196 : vector<8x32xf32>
    %198 = tpu.concatenate %153, %197 in 0 : vector<8x32xf32>, vector<8x32xf32> -> vector<16x32xf32>
    %199 = arith.addf %103, %198 : vector<16x32xf32>
    %cst_80 = arith.constant dense<0.000000e+00> : vector<16xf32>
    %200 = vector.multi_reduction <add>, %199, %cst_80 [1] : vector<16x32xf32> to vector<16xf32>
    %201 = vector.shape_cast %200 : vector<16xf32> to vector<16x1xf32>
    %cst_81 = arith.constant 3.200000e+01 : f32
    %202 = vector.broadcast %cst_81 : f32 to vector<16x1xf32>
    %203 = arith.divf %201, %202 : vector<16x1xf32>
    %204 = vector.broadcast %203 : vector<16x1xf32> to vector<16x32xf32>
    %205 = arith.subf %199, %204 : vector<16x32xf32>
    %206 = arith.mulf %205, %205 : vector<16x32xf32>
    %cst_82 = arith.constant dense<0.000000e+00> : vector<16xf32>
    %207 = vector.multi_reduction <add>, %206, %cst_82 [1] : vector<16x32xf32> to vector<16xf32>
    %208 = vector.shape_cast %207 : vector<16xf32> to vector<16x1xf32>
    %cst_83 = arith.constant 3.200000e+01 : f32
    %209 = vector.broadcast %cst_83 : f32 to vector<16x1xf32>
    %210 = arith.divf %208, %209 : vector<16x1xf32>
    %cst_84 = arith.constant 9.99999974E-6 : f32
    %211 = vector.broadcast %cst_84 : f32 to vector<16x1xf32>
    %212 = arith.addf %210, %211 : vector<16x1xf32>
    %213 = math.rsqrt %212 : vector<16x1xf32>
    %214 = vector.broadcast %213 : vector<16x1xf32> to vector<16x32xf32>
    %215 = arith.mulf %205, %214 : vector<16x32xf32>
    %216 = vector.broadcast %2 : vector<1x32xf32> to vector<16x32xf32>
    %217 = arith.mulf %215, %216 : vector<16x32xf32>
    %218 = vector.broadcast %3 : vector<1x32xf32> to vector<16x32xf32>
    %219 = arith.addf %217, %218 : vector<16x32xf32>
    %220 = arith.truncf %219 : vector<16x32xf32> to vector<16x32xbf16>
    %c0_85 = arith.constant 0 : index
    %c0_86 = arith.constant 0 : index
    %221 = vector.load %arg14[%c0_85, %c0_86] : memref<32x64xbf16, #tpu.memory_space<vmem>>, vector<32x64xbf16>
    %cst_87 = arith.constant dense<0.000000e+00> : vector<16x64xf32>
    %222 = tpu.matmul %220, %221, %cst_87 {dimension_numbers = #tpu.dot_dimension_numbers<[1], [0], [0], [1], [0, 0, 1, 1], [], []>} : vector<16x32xbf16>, vector<32x64xbf16>, vector<16x64xf32> -> vector<16x64xf32>
    %c0_88 = arith.constant 0 : index
    %c0_89 = arith.constant 0 : index
    %223 = vector.load %arg15[%c0_88, %c0_89] : memref<1x64xf32, #tpu.memory_space<vmem>>, vector<1x64xf32>
    %224 = vector.broadcast %223 : vector<1x64xf32> to vector<16x64xf32>
    %225 = arith.addf %222, %224 : vector<16x64xf32>
    %cst_90 = arith.constant 0.000000e+00 : f32
    %226 = vector.broadcast %cst_90 : f32 to vector<16x64xf32>
    %227 = arith.maximumf %225, %226 : vector<16x64xf32>
    %228 = arith.truncf %227 : vector<16x64xf32> to vector<16x64xbf16>
    %c0_91 = arith.constant 0 : index
    %c0_92 = arith.constant 0 : index
    %229 = vector.load %arg16[%c0_91, %c0_92] : memref<64x32xbf16, #tpu.memory_space<vmem>>, vector<64x32xbf16>
    %cst_93 = arith.constant dense<0.000000e+00> : vector<16x32xf32>
    %230 = tpu.matmul %228, %229, %cst_93 {dimension_numbers = #tpu.dot_dimension_numbers<[1], [0], [0], [1], [0, 0, 1, 1], [], []>} : vector<16x64xbf16>, vector<64x32xbf16>, vector<16x32xf32> -> vector<16x32xf32>
    %c0_94 = arith.constant 0 : index
    %c0_95 = arith.constant 0 : index
    %231 = vector.load %arg17[%c0_94, %c0_95] : memref<1x32xf32, #tpu.memory_space<vmem>>, vector<1x32xf32>
    %232 = vector.broadcast %231 : vector<1x32xf32> to vector<16x32xf32>
    %233 = arith.addf %230, %232 : vector<16x32xf32>
    %234 = arith.addf %219, %233 : vector<16x32xf32>
    %cst_96 = arith.constant dense<0.000000e+00> : vector<16xf32>
    %235 = vector.multi_reduction <add>, %234, %cst_96 [1] : vector<16x32xf32> to vector<16xf32>
    %236 = vector.shape_cast %235 : vector<16xf32> to vector<16x1xf32>
    %cst_97 = arith.constant 3.200000e+01 : f32
    %237 = vector.broadcast %cst_97 : f32 to vector<16x1xf32>
    %238 = arith.divf %236, %237 : vector<16x1xf32>
    %239 = vector.broadcast %238 : vector<16x1xf32> to vector<16x32xf32>
    %240 = arith.subf %234, %239 : vector<16x32xf32>
    %241 = arith.mulf %240, %240 : vector<16x32xf32>
    %cst_98 = arith.constant dense<0.000000e+00> : vector<16xf32>
    %242 = vector.multi_reduction <add>, %241, %cst_98 [1] : vector<16x32xf32> to vector<16xf32>
    %243 = vector.shape_cast %242 : vector<16xf32> to vector<16x1xf32>
    %cst_99 = arith.constant 3.200000e+01 : f32
    %244 = vector.broadcast %cst_99 : f32 to vector<16x1xf32>
    %245 = arith.divf %243, %244 : vector<16x1xf32>
    %cst_100 = arith.constant 9.99999974E-6 : f32
    %246 = vector.broadcast %cst_100 : f32 to vector<16x1xf32>
    %247 = arith.addf %245, %246 : vector<16x1xf32>
    %248 = math.rsqrt %247 : vector<16x1xf32>
    %249 = vector.broadcast %248 : vector<16x1xf32> to vector<16x32xf32>
    %250 = arith.mulf %240, %249 : vector<16x32xf32>
    %251 = vector.broadcast %2 : vector<1x32xf32> to vector<16x32xf32>
    %252 = arith.mulf %250, %251 : vector<16x32xf32>
    %253 = vector.broadcast %3 : vector<1x32xf32> to vector<16x32xf32>
    %254 = arith.addf %252, %253 : vector<16x32xf32>
    %c0_101 = arith.constant 0 : index
    %c0_102 = arith.constant 0 : index
    %255 = vector.load %arg20[%c0_101, %c0_102] : memref<16x32xf32, #tpu.memory_space<vmem>>, vector<16x32xf32>
    tpu.vector_store %arg20[%c0_101, %c0_102], %254 {strides = array<i32>} : memref<16x32xf32, #tpu.memory_space<vmem>>, vector<16x32xf32>,
    return
  }
}

</mosaic_0001>

<bundles_post_ra>
// kernel: attn_decoder_layer.1
= control target key start
LH: loop header
LB: loop body
LE: loop exit
PB: predicated region body
PF: predicated region fallthrough
CT: control target
= control target key end

     0   :  { %s6167_s0 = inlined_call_operand.vmem [shape: f32[16,32], index: 0, kind: input, shape index: {}]   ;;  %s6168_s1 = inlined_call_operand.vmem [shape: f32[16,32], index: 1, kind: input, shape index: {}]   ;;  %s6169_s2 = inlined_call_operand.vmem [shape: f32[2,8,8], index: 2, kind: input, shape index: {}]   ;;  %s6170_s3 = inlined_call_operand.vmem [shape: f32[2,8,8], index: 3, kind: input, shape index: {}]   ;;  %s6171_s4 = inlined_call_operand.vmem [shape: bf16[4,32,24], index: 4, kind: input, shape index: {}]   ;;  %s6172_s5 = inlined_call_operand.vmem [shape: f32[4,1,24], index: 5, kind: input, shape index: {}]   ;;  %s6173_s6 = inlined_call_operand.vmem [shape: bf16[4,8,32], index: 6, kind: input, shape index: {}]   ;;  %s6174_s7 = inlined_call_operand.vmem [shape: f32[1,32], index: 7, kind: input, shape index: {}]   ;;  %s6175_s8 = inlined_call_operand.vmem [shape: bf16[4,32,8], index: 8, kind: input, shape index: {}]   ;;  %s6176_s9 = inlined_call_operand.vmem [shape: f32[4,1,8], index: 9, kind: input, shape index: {}]   ;;  %s6177_s10 = inlined_call_operand.vmem [shape: bf16[4,32,16], index: 10, kind: input, shape index: {}]   ;;  %s6178_s11 = inlined_call_operand.vmem [shape: f32[4,1,16], index: 11, kind: input, shape index: {}]   ;;  %s6179_s12 = inlined_call_operand.vmem [shape: bf16[4,8,32], index: 12, kind: input, shape index: {}]   ;;  %s6180_s13 = inlined_call_operand.vmem [shape: f32[1,32], index: 13, kind: input, shape index: {}]   ;;  %s6181_s14 = inlined_call_operand.vmem [shape: bf16[32,64], index: 14, kind: input, shape index: {}]   ;;  %s6182_s15 = inlined_call_operand.vmem [shape: f32[1,64], index: 15, kind: input, shape index: {}]   ;;  %s6183_s16 = inlined_call_operand.vmem [shape: bf16[64,32], index: 16, kind: input, shape index: {}]   ;;  %s6184_s17 = inlined_call_operand.vmem [shape: f32[1,32], index: 17, kind: input, shape index: {}]   ;;  %s6185_s18 = inlined_call_operand.vmem [shape: f32[1,32], index: 18, kind: input, shape index: {}]   ;;  %s6186_s19 = inlined_call_operand.vmem [shape: f32[1,32], index: 19, kind: input, shape index: {}]   ;;  %s6187_s20 = inlined_call_operand.hbm [shape: f32[16,32], index: 20, kind: output, shape index: {}]  }
   0x1   :  { %6193 = sst [smem:[#allocation5_spill]] %s6167_s0 }
   0x2   :  { %6194 = sst [smem:[#allocation6_spill]] %s6168_s1 }
   0x3   :  { %6195 = sst [smem:[#allocation7_spill]] %s6169_s2 }
   0x4   :  { %6196 = sst [smem:[#allocation8_spill]] %s6170_s3 }
   0x5   :  { %6197 = sst [smem:[#allocation9_spill]] %s6171_s4 }
   0x6   :  { %s6198_s23 = sld [smem:[#allocation9_spill]]  ;;  %v5095_v1 = vmov 0.0   ;;  %vm5096_vm0 = vmmov 0   ;;  %vm135_vm1 = vcmask 261120  }
   0x7   :  { %4458 = vmatprep.subr.bf16.mxu0 %v5095_v1  ;;  %4466 = vmatprep.subr.bf16.mxu1 %v5095_v1  ;;  %s6199_s29 = sld [smem:[#allocation5_spill]] }
   0x8   :  { %4462 = vmatprep.mubr.msk.bf16.mxu0 %vm5096_vm0, %v5095_v1  ;;  %4470 = vmatprep.mubr.msk.bf16.mxu1 %vm5096_vm0, %v5095_v1 }
   0xc   :  { %v5210_v0 = vld [vmem:[%s6198_s23 + $0x8] sm:$0xff]   ;;  %v5217_v2 = vld [vmem:[%s6198_s23 + $0x18] sm:$0xff]   ;;  %v5223_v3 = vld [vmem:[%s6198_s23] sm:$0xff]  }
   0xd   :  { %4459 = vmatpush3.bf16.msra.mxu0 %v5210_v0  ;;  %4467 = vmatpush3.bf16.msra.mxu1 %v5217_v2  ;;  %v5232_v4 = vld [vmem:[%s6198_s23 + $0x10] sm:$0xff]   ;;  %v5240_v5 = vld [vmem:[%s6199_s29] sm:$0xff]  ;;  %v5248_v7 = vld [vmem:[%s6198_s23 + $0x28] sm:$0xff]  }
   0xe   :  { %4460 = vmatprep.subr.bf16.mxu0 %v5095_v1  ;;  %4468 = vmatprep.subr.bf16.mxu1 %v5095_v1  ;;  %v98_v6 = vpack.c.bf16 %v5240_v5, %v5240_v5  ;;  %v5255_v8 = vld [vmem:[%s6198_s23 + $0x38] sm:$0xff]   ;;  %v5261_v9 = vld [vmem:[%s6198_s23 + $0x20] sm:$0xff]   ;;  %v5267_v10 = vld [vmem:[%s6198_s23 + $0x30] sm:$0xff]  }
  0x11   :  { %4461 = vmatpush3.bf16.msra.mxu0 %v5223_v3  ;;  %4469 = vmatpush3.bf16.msra.mxu1 %v5232_v4 }
  0x12   :  { %4474 = vmatprep.subr.bf16.mxu0 %v5095_v1  ;;  %4482 = vmatprep.subr.bf16.mxu1 %v5095_v1 }
  0x14   :  { %4463 = vmatmul.mubr.msk.bf16.vlgmr.msra.gmra.mxu0 %vm135_vm1, %v98_v6  ;;  %4471 = vmatmul.mubr.msk.bf16.vlgmr.msra.gmra.mxu1 %vm135_vm1, %v98_v6 }
  0x15   :  { %4475 = vmatpush3.bf16.msra.mxu0 %v5248_v7  ;;  %4483 = vmatpush3.bf16.msra.mxu1 %v5255_v8 }
  0x16   :  { %4476 = vmatprep.subr.bf16.mxu0 %v5095_v1  ;;  %4484 = vmatprep.subr.bf16.mxu1 %v5095_v1 }
  0x17   :  { %4478 = vmatprep.mubr.msk.bf16.mxu0 %vm5096_vm0, %v5095_v1  ;;  %4486 = vmatprep.mubr.msk.bf16.mxu1 %vm5096_vm0, %v5095_v1 }
  0x19   :  { %4477 = vmatpush3.bf16.msra.mxu0 %v5261_v9  ;;  %4485 = vmatpush3.bf16.msra.mxu1 %v5267_v10 }
  0x1a   :  { %4490 = vmatprep.subr.bf16.mxu0 %v5095_v1  ;;  %4496 = vmatprep.subr.bf16.mxu1 %v5095_v1 }
  0x1c   :  { %4479 = vmatmul.mubr.msk.bf16.vlgmr.msra.gmra.mxu0 %vm135_vm1, %v98_v6  ;;  %4487 = vmatmul.mubr.msk.bf16.vlgmr.msra.gmra.mxu1 %vm135_vm1, %v98_v6 }
  0x1d   :  { %4492 = vmatprep.mubr.msk.bf16.mxu0 %vm5096_vm0, %v5095_v1  ;;  %4498 = vmatprep.mubr.msk.bf16.mxu1 %vm5096_vm0, %v5095_v1 }
  0x1e   :  { %25 = vsyncpa [#allocation3], 0  ;;  %v5291_v11 = vld [vmem:[%s6172_s5] ss:$0 sm:$0xff]  ;;  %v5296_v12 = vld [vmem:[%s6172_s5 + $0x1] ss:$0 sm:$0xff] }
  0x1f   :  { %s5097_s28 = smov 120   ;;  %v5309_v24 = vld [vmem:[%s6172_s5 + $0x2] ss:$0 sm:$0xff]  ;;  %v5314_v26 = vld [vmem:[%s6172_s5 + $0x3] ss:$0 sm:$0xff]  ;;  %vm343_vm2 = vcmask 64512  }
  0x20   :  { %s6200_s22 = sld [smem:[#allocation7_spill]]  ;;  %s5098_s24 = smov 112   ;;  %vm590_vm3 = vcmask 1043456   ;;  %vm4063_vm4 = vcmask 523264  }
  0x21   :  { %s6201_s0 = sld [smem:[#allocation6_spill]] }
  0x26   :  { %v335_v47 = vld [vmem:[%s6200_s22] sm:$0xff] }
  0xd4   :  { %v173_v13 = vpop.f32.mrf.mxu0  ;;  %v225_v15 = vpop.f32.mrf.mxu1 }
  0xd5   :  { %v174_v14 = vadd.f32 %v5291_v11, %v173_v13  ;;  %v226_v16 = vadd.f32 %v5296_v12, %v225_v15 }
  0xd6   :  { %v4464_v17 = vpop.f32.mrf.mxu0  ;;  %v4472_v19 = vpop.f32.mrf.mxu1 }
  0xd7   :  { %v5300_v18 = vpack.c.bf16 %v174_v14, %v174_v14  ;;  %v5302_v21 = vpack.c.bf16 %v226_v16, %v226_v16 }
  0xd8   :  { %v176_v20 = vpop.f32.mrf.mxu0  ;;  %v228_v22 = vpop.f32.mrf.mxu1 }
  0xd9   :  { %341 = vrot.lane.b32.xlu0 %v5300_v18, %s5097_s28 }
  0xda   :  { %v4465_v23 = vpop.f32.mrf.mxu0  ;;  %v4473_v25 = vpop.f32.mrf.mxu1 }
  0xdc   :  { %v277_v27 = vpop.f32.mrf.mxu0  ;;  %v329_v29 = vpop.f32.mrf.mxu1 }
  0xdd   :  { %v278_v28 = vadd.f32 %v5309_v24, %v277_v27  ;;  %391 = vrot.lane.b32.xlu0 %v5302_v21, %s5097_s28  ;;  %v330_v30 = vadd.f32 %v5314_v26, %v329_v29 }
  0xde   :  { %v4480_v31 = vpop.f32.mrf.mxu0  ;;  %v4488_v33 = vpop.f32.mrf.mxu1 }
  0xdf   :  { %v5320_v32 = vpack.c.bf16 %v278_v28, %v278_v28  ;;  %v5322_v35 = vpack.c.bf16 %v330_v30, %v330_v30 }
  0xe0   :  { %v280_v34 = vpop.f32.mrf.mxu0  ;;  %v332_v36 = vpop.f32.mrf.mxu1 }
  0xe1   :  { %440 = vrot.lane.b32.xlu1 %v5320_v32, %s5097_s28 }
  0xe2   :  { %v4481_v37 = vpop.f32.mrf.mxu0  ;;  %v4489_v38 = vpop.f32.mrf.mxu1 }
  0xe5   :  { %489 = vrot.lane.b32.xlu1 %v5322_v35, %s5097_s28 }
 0x14b   :  { %v342_v39 = vpop.permute.xlu0 %341 }
 0x14c   :  { %v348_v40 = vsel %vm343_vm2, %v342_v39, 0 }
 0x14d   :  { %4491 = vmatpush3.bf16.xpose.msra.mxu0 %v348_v40 }
 0x14e   :  { %4502 = vmatprep.subr.bf16.mxu0 %v5095_v1 }
 0x14f   :  { %v392_v41 = vpop.permute.xlu0 %391 }
 0x150   :  { %v397_v42 = vsel %vm343_vm2, %v392_v41, 0 }
 0x151   :  { %4497 = vmatpush3.bf16.xpose.msra.mxu1 %v397_v42 }
 0x152   :  { %4508 = vmatprep.subr.bf16.mxu1 %v5095_v1 }
 0x153   :  { %v441_v43 = vpop.permute.xlu1 %440 }
 0x154   :  { %v446_v44 = vsel %vm343_vm2, %v441_v43, 0  ;;  %4493 = vmatmul.mubr.msk.bf16.vlgmr.msra.gmra.mxu0 %vm343_vm2, %v5300_v18 }
 0x155   :  { %4503 = vmatpush3.bf16.xpose.msra.mxu0 %v446_v44  ;;  %4504 = vmatprep.mubr.msk.bf16.mxu0 %vm5096_vm0, %v5095_v1 }
 0x156   :  { %4514 = vmatprep.subr.bf16.mxu0 %v5095_v1 }
 0x157   :  { %v490_v45 = vpop.permute.xlu1 %489 }
 0x158   :  { %v495_v46 = vsel %vm343_vm2, %v490_v45, 0  ;;  %4499 = vmatmul.mubr.msk.bf16.vlgmr.msra.gmra.mxu1 %vm343_vm2, %v5302_v21 }
 0x159   :  { %4509 = vmatpush3.bf16.xpose.msra.mxu1 %v495_v46  ;;  %4510 = vmatprep.mubr.msk.bf16.mxu1 %vm5096_vm0, %v5095_v1 }
 0x15a   :  { %4520 = vmatprep.subr.bf16.mxu1 %v5095_v1 }
 0x15c   :  { %4505 = vmatmul.mubr.msk.bf16.vlgmr.msra.gmra.mxu0 %vm343_vm2, %v5320_v32 }
 0x15d   :  { %4516 = vmatprep.mubr.msk.bf16.mxu0 %vm5096_vm0, %v5095_v1 }
 0x160   :  { %4511 = vmatmul.mubr.msk.bf16.vlgmr.msra.gmra.mxu1 %vm343_vm2, %v5322_v35 }
 0x161   :  { %4522 = vmatprep.mubr.msk.bf16.mxu1 %vm5096_vm0, %v5095_v1 }
 0x214   :  { %v384_v48 = vpop.f32.mrf.mxu0 }
 0x215   :  { %v385_v49 = vadd.f32 %v384_v48, %v335_v47 }
 0x216   :  { %v4494_v50 = vpop.f32.mrf.mxu0 }
 0x217   :  { %v537_v51 = vsel %vm343_vm2, %v385_v49, -inf }
 0x218   :  { %v433_v52 = vpop.f32.mrf.mxu1  ;;  %538 = vmax.xlane.f32.xlu0 %v537_v51  ;;  %v387_v53 = vpop.f32.mrf.mxu0 }
 0x219   :  { %v434_v54 = vadd.f32 %v433_v52, %v335_v47 }
 0x21a   :  { %v4495_v55 = vpop.f32.mrf.mxu0  ;;  %v4500_v56 = vpop.f32.mrf.mxu1 }
 0x21b   :  { %v540_v57 = vsel %vm343_vm2, %v434_v54, -inf }
 0x21c   :  { %v436_v58 = vpop.f32.mrf.mxu1  ;;  %541 = vmax.xlane.f32.xlu1 %v540_v57  ;;  %v482_v59 = vpop.f32.mrf.mxu0 }
 0x21d   :  { %v483_v60 = vadd.f32 %v482_v59, %v335_v47 }
 0x21e   :  { %v4501_v61 = vpop.f32.mrf.mxu1  ;;  %v4506_v62 = vpop.f32.mrf.mxu0 }
 0x21f   :  { %v543_v63 = vsel %vm343_vm2, %v483_v60, -inf }
 0x220   :  { %v531_v6 = vpop.f32.mrf.mxu1  ;;  %544 = vmax.xlane.f32.xlu0 %v543_v63  ;;  %v485_v13 = vpop.f32.mrf.mxu0 }
 0x221   :  { %v532_v14 = vadd.f32 %v531_v6, %v335_v47 }
 0x222   :  { %v4507_v15 = vpop.f32.mrf.mxu0  ;;  %v4512_v16 = vpop.f32.mrf.mxu1 }
 0x223   :  { %v546_v17 = vsel %vm343_vm2, %v532_v14, -inf  ;;  %v94_v16 = vld [vmem:[%s6173_s6 + $0x4] sm:$0xf] }
 0x224   :  { %v534_v19 = vpop.f32.mrf.mxu1  ;;  %547 = vmax.xlane.f32.xlu0 %v546_v17  ;;  %v5403_v17 = vsel %vm590_vm3, %v94_v16, 0 }
 0x225   :  { %v95_v19 = vld [vmem:[%s6173_s6 + $0x8] sm:$0xf] }
 0x226   :  { %v4513_v20 = vpop.f32.mrf.mxu1 }
 0x22d   :  { %585 = vrot.lane.b32.xlu1 %v5300_v18, %s5098_s24 }
 0x2a1   :  { %v539_v22 = vpop.xlane.xlu0 %538 }
 0x2a2   :  { %v549_v23 = vsub.f32 %v385_v49, %v539_v22 }
 0x2a4   :  { %v553_v25 = vmul.f32 1.442695, %v549_v23  ;;  %v5411_v23 = vsel %vm590_vm3, %v95_v19, 0 }
 0x2a5   :  { %v542_v27 = vpop.xlane.xlu1 %541 }
 0x2a6   :  { %4995 = vpow2.f32 %v553_v25  ;;  %v550_v28 = vsub.f32 %v434_v54, %v542_v27  ;;  %v96_v27 = vld [vmem:[%s6173_s6 + $0xc] sm:$0xf] }
 0x2a8   :  { %v555_v29 = vmul.f32 1.442695, %v550_v28 }
 0x2a9   :  { %v586_v30 = vpop.permute.xlu1 %585  ;;  %v545_v31 = vpop.xlane.xlu0 %544 }
 0x2aa   :  { %4997 = vpow2.f32 %v555_v29  ;;  %v592_v33 = vsel %vm590_vm3, %v586_v30, 0  ;;  %v551_v34 = vsub.f32 %v483_v60, %v545_v31  ;;  %v93_v60 = vld [vmem:[%s6173_s6] sm:$0xf]  ;;  %v5421_v31 = vsel %vm590_vm3, %v96_v27, 0 }
 0x2ab   :  { %4515 = vmatpush3.bf16.msra.mxu0 %v592_v33  ;;  %v5388_v6 = vsel %vm590_vm3, %v93_v60, 0 }
 0x2ac   :  { %v557_v36 = vmul.f32 1.442695, %v551_v34  ;;  %4526 = vmatprep.subr.bf16.mxu0 %v5095_v1 }
 0x2ad   :  { %v548_v37 = vpop.xlane.xlu0 %547 }
 0x2ae   :  { %4999 = vpow2.f32 %v557_v36  ;;  %v552_v18 = vsub.f32 %v532_v14, %v548_v37 }
 0x2b0   :  { %v559_v38 = vmul.f32 1.442695, %v552_v18 }
 0x2b2   :  { %5001 = vpow2.f32 %v559_v38 }
 0x2b3   :  { %v4996_v39 = vpop.eup %4995 }
 0x2b4   :  { %v561_v40 = vsel %vm343_vm2, %v4996_v39, 0.0 }
 0x2b5   :  { %562 = vadd.xlane.f32.xlu1 %v561_v40 }
 0x2b7   :  { %v4998_v41 = vpop.eup %4997 }
 0x2b8   :  { %v564_v42 = vsel %vm343_vm2, %v4998_v41, 0.0 }
 0x2b9   :  { %565 = vadd.xlane.f32.xlu0 %v564_v42  ;;  %v5436_v42 = vld [vmem:[%s6199_s29 + $0x8] sm:$0xff] }
 0x2bb   :  { %v5000_v43 = vpop.eup %4999 }
 0x2bc   :  { %v567_v44 = vsel %vm343_vm2, %v5000_v43, 0.0 }
 0x2bd   :  { %568 = vadd.xlane.f32.xlu1 %v567_v44 }
 0x2bf   :  { %v5002_v45 = vpop.eup %5001 }
 0x2c0   :  { %v570_v46 = vsel %vm343_vm2, %v5002_v45, 0.0 }
 0x2c1   :  { %571 = vadd.xlane.f32.xlu0 %v570_v46  ;;  %v980_v46 = vpack.c.bf16 %v5436_v42, %v5436_v42 }
 0x2ce   :  { %682 = vrot.lane.b32.xlu1 %v5320_v32, %s5098_s24 }
 0x2d2   :  { %730 = vrot.lane.b32.xlu1 %v5322_v35, %s5098_s24 }
 0x2d7   :  { %634 = vrot.lane.b32.xlu0 %v5302_v21, %s5098_s24 }
 0x33e   :  { %v563_v47 = vpop.xlane.xlu1 %562 }
 0x33f   :  { %5003 = vrcp.f32 %v563_v47 }
 0x342   :  { %v566_v48 = vpop.xlane.xlu0 %565 }
 0x343   :  { %5005 = vrcp.f32 %v566_v48 }
 0x346   :  { %v569_v49 = vpop.xlane.xlu1 %568 }
 0x347   :  { %5007 = vrcp.f32 %v569_v49 }
 0x34a   :  { %v572_v50 = vpop.xlane.xlu0 %571  ;;  %v683_v52 = vpop.permute.xlu1 %682 }
 0x34b   :  { %5009 = vrcp.f32 %v572_v50  ;;  %v688_v35 = vsel %vm590_vm3, %v683_v52, 0 }
 0x34c   :  { %v5004_v51 = vpop.eup %5003 }
 0x34d   :  { %v577_v53 = vmul.f32 %v5004_v51, %v4996_v39 }
 0x34e   :  { %v635_v54 = vpop.permute.xlu0 %634  ;;  %v731_v57 = vpop.permute.xlu1 %730 }
 0x34f   :  { %v640_v32 = vsel %vm590_vm3, %v635_v54, 0  ;;  %v581_v55 = vpack.c.bf16 %v577_v53, %v577_v53  ;;  %v736_v61 = vsel %vm590_vm3, %v731_v57, 0 }
 0x350   :  { %v5006_v56 = vpop.eup %5005  ;;  %4521 = vmatpush3.bf16.msra.mxu1 %v640_v32 }
 0x351   :  { %4517 = vmatmul.mubr.msk.bf16.vlgmr.msra.gmra.mxu0 %vm343_vm2, %v581_v55  ;;  %4532 = vmatprep.subr.bf16.mxu1 %v5095_v1  ;;  %v578_v21 = vmul.f32 %v5006_v56, %v4998_v41 }
 0x352   :  { %4527 = vmatpush3.bf16.msra.mxu0 %v688_v35  ;;  %4528 = vmatprep.mubr.msk.bf16.mxu0 %vm5096_vm0, %v5095_v1 }
 0x353   :  { %v582_v58 = vpack.c.bf16 %v578_v21, %v578_v21  ;;  %4538 = vmatprep.subr.bf16.mxu0 %v5095_v1 }
 0x354   :  { %v5008_v59 = vpop.eup %5007 }
 0x355   :  { %4523 = vmatmul.mubr.msk.bf16.vlgmr.msra.gmra.mxu1 %vm343_vm2, %v582_v58  ;;  %v579_v62 = vmul.f32 %v5008_v59, %v5000_v43 }
 0x356   :  { %4533 = vmatpush3.bf16.msra.mxu1 %v736_v61  ;;  %4534 = vmatprep.mubr.msk.bf16.mxu1 %vm5096_vm0, %v5095_v1 }
 0x357   :  { %v583_v63 = vpack.c.bf16 %v579_v62, %v579_v62  ;;  %4544 = vmatprep.subr.bf16.mxu1 %v5095_v1 }
 0x358   :  { %v5010_v13 = vpop.eup %5009 }
 0x359   :  { %4529 = vmatmul.mubr.msk.bf16.vlgmr.msra.gmra.mxu0 %vm343_vm2, %v583_v63  ;;  %v580_v14 = vmul.f32 %v5010_v13, %v5002_v45 }
 0x35a   :  { %4539 = vmatpush3.bf16.msra.mxu0 %v5388_v6  ;;  %4540 = vmatprep.mubr.msk.bf16.mxu0 %vm5096_vm0, %v5095_v1 }
 0x35b   :  { %v584_v15 = vpack.c.bf16 %v580_v14, %v580_v14  ;;  %4550 = vmatprep.subr.bf16.mxu0 %v5095_v1 }
 0x35d   :  { %4535 = vmatmul.mubr.msk.bf16.vlgmr.msra.gmra.mxu1 %vm343_vm2, %v584_v15 }
 0x35e   :  { %4546 = vmatprep.mubr.msk.bf16.mxu1 %vm5096_vm0, %v5095_v1  ;;  %4545 = vmatpush3.bf16.msra.mxu1 %v5403_v17 }
 0x35f   :  { %4556 = vmatprep.subr.bf16.mxu1 %v5095_v1 }
 0x411   :  { %v628_v20 = vpop.f32.mrf.mxu0 }
 0x412   :  { %v778_v22 = vpack.c.bf16 %v628_v20, %v628_v20 }
 0x413   :  { %v4518_v25 = vpop.f32.mrf.mxu0 }
 0x414   :  { %4541 = vmatmul.mubr.msk.bf16.vlgmr.msra.gmra.mxu0 %vm343_vm2, %v778_v22 }
 0x415   :  { %v631_v28 = vpop.f32.mrf.mxu0  ;;  %v676_v29 = vpop.f32.mrf.mxu1  ;;  %4551 = vmatpush3.bf16.msra.mxu0 %v5411_v23  ;;  %4552 = vmatprep.mubr.msk.bf16.mxu0 %vm5096_vm0, %v5095_v1 }
 0x416   :  { %v779_v30 = vpack.c.bf16 %v676_v29, %v676_v29  ;;  %4562 = vmatprep.subr.bf16.mxu0 %v5095_v1 }
 0x417   :  { %v4519_v33 = vpop.f32.mrf.mxu0  ;;  %v4524_v34 = vpop.f32.mrf.mxu1 }
 0x418   :  { %4547 = vmatmul.mubr.msk.bf16.vlgmr.msra.gmra.mxu1 %vm343_vm2, %v779_v30 }
 0x419   :  { %v679_v36 = vpop.f32.mrf.mxu1  ;;  %v724_v37 = vpop.f32.mrf.mxu0  ;;  %4557 = vmatpush3.bf16.msra.mxu1 %v5421_v31  ;;  %4558 = vmatprep.mubr.msk.bf16.mxu1 %vm5096_vm0, %v5095_v1 }
 0x41a   :  { %v780_v18 = vpack.c.bf16 %v724_v37, %v724_v37  ;;  %4570 = vmatprep.subr.bf16.mxu1 %v5095_v1 }
 0x41b   :  { %v4525_v38 = vpop.f32.mrf.mxu1  ;;  %v4530_v39 = vpop.f32.mrf.mxu0 }
 0x41c   :  { %4553 = vmatmul.mubr.msk.bf16.vlgmr.msra.gmra.mxu0 %vm343_vm2, %v780_v18 }
 0x41d   :  { %v727_v40 = vpop.f32.mrf.mxu0  ;;  %v772_v41 = vpop.f32.mrf.mxu1  ;;  %4563 = vmatpush3.bf16.msra.mxu0 %v5210_v0  ;;  %4566 = vmatprep.mubr.msk.bf16.mxu0 %vm5096_vm0, %v5095_v1 }
 0x41e   :  { %v781_v43 = vpack.c.bf16 %v772_v41, %v772_v41  ;;  %4564 = vmatprep.subr.bf16.mxu0 %v5095_v1 }
 0x41f   :  { %v4531_v44 = vpop.f32.mrf.mxu0  ;;  %v4536_v45 = vpop.f32.mrf.mxu1 }
 0x420   :  { %4559 = vmatmul.mubr.msk.bf16.vlgmr.msra.gmra.mxu1 %vm343_vm2, %v781_v43 }
 0x421   :  { %v775_v47 = vpop.f32.mrf.mxu1  ;;  %4565 = vmatpush3.bf16.msra.mxu0 %v5223_v3  ;;  %4571 = vmatpush3.bf16.msra.mxu1 %v5217_v2 }
 0x422   :  { %4572 = vmatprep.subr.bf16.mxu1 %v5095_v1  ;;  %4578 = vmatprep.subr.bf16.mxu0 %v5095_v1  ;;  %v4191_v47 = vld [vmem:[%s6200_s22 + $0x8] sm:$0xff] }
 0x423   :  { %v4537_v0 = vpop.f32.mrf.mxu1  ;;  %4574 = vmatprep.mubr.msk.bf16.mxu1 %vm5096_vm0, %v5095_v1 }
 0x424   :  { %4567 = vmatmul.mubr.msk.bf16.vlgmr.msra.gmra.mxu0 %vm135_vm1, %v980_v46 }
 0x425   :  { %4573 = vmatpush3.bf16.msra.mxu1 %v5232_v4  ;;  %4579 = vmatpush3.bf16.msra.mxu0 %v5248_v7 }
 0x426   :  { %4580 = vmatprep.subr.bf16.mxu0 %v5095_v1  ;;  %4586 = vmatprep.subr.bf16.mxu1 %v5095_v1 }
 0x427   :  { %4582 = vmatprep.mubr.msk.bf16.mxu0 %vm5096_vm0, %v5095_v1 }
 0x428   :  { %4575 = vmatmul.mubr.msk.bf16.vlgmr.msra.gmra.mxu1 %vm135_vm1, %v980_v46 }
 0x429   :  { %4581 = vmatpush3.bf16.msra.mxu0 %v5261_v9  ;;  %4587 = vmatpush3.bf16.msra.mxu1 %v5255_v8 }
 0x42a   :  { %4588 = vmatprep.subr.bf16.mxu1 %v5095_v1  ;;  %4590 = vmatprep.mubr.msk.bf16.mxu1 %vm5096_vm0, %v5095_v1 }
 0x42b   :  { %4594 = vmatprep.subr.bf16.mxu0 %v5095_v1 }
 0x42c   :  { %4583 = vmatmul.mubr.msk.bf16.vlgmr.msra.gmra.mxu0 %vm135_vm1, %v980_v46 }
 0x42d   :  { %4589 = vmatpush3.bf16.msra.mxu1 %v5267_v10  ;;  %4596 = vmatprep.mubr.msk.bf16.mxu0 %vm5096_vm0, %v5095_v1 }
 0x42e   :  { %4600 = vmatprep.subr.bf16.mxu1 %v5095_v1 }
 0x430   :  { %4591 = vmatmul.mubr.msk.bf16.vlgmr.msra.gmra.mxu1 %vm135_vm1, %v980_v46 }
 0x431   :  { %4602 = vmatprep.mubr.msk.bf16.mxu1 %vm5096_vm0, %v5095_v1 }
 0x4d4   :  { %v822_v2 = vpop.f32.mrf.mxu0 }
 0x4d5   :  { %v966_v8 = vsel %vm135_vm1, %v822_v2, 0.0 }
 0x4d6   :  { %v4542_v3 = vpop.f32.mrf.mxu0 }
 0x4d8   :  { %v825_v4 = vpop.f32.mrf.mxu0  ;;  %v868_v7 = vpop.f32.mrf.mxu1 }
 0x4d9   :  { %v967_v9 = vsel %vm135_vm1, %v868_v7, 0.0 }
 0x4da   :  { %v968_v48 = vadd.f32 %v967_v9, %v966_v8  ;;  %v4543_v10 = vpop.f32.mrf.mxu0  ;;  %v4548_v49 = vpop.f32.mrf.mxu1 }
 0x4dc   :  { %v871_v50 = vpop.f32.mrf.mxu1  ;;  %v914_v51 = vpop.f32.mrf.mxu0 }
 0x4dd   :  { %v969_v52 = vsel %vm135_vm1, %v914_v51, 0.0 }
 0x4de   :  { %v970_v53 = vadd.f32 %v969_v52, %v968_v48  ;;  %v4549_v54 = vpop.f32.mrf.mxu1  ;;  %v4554_v32 = vpop.f32.mrf.mxu0 }
 0x4e0   :  { %v917_v55 = vpop.f32.mrf.mxu0  ;;  %v960_v56 = vpop.f32.mrf.mxu1 }
 0x4e1   :  { %v971_v35 = vsel %vm135_vm1, %v960_v56, 0.0 }
 0x4e2   :  { %v5474_v21 = vadd.f32 %v971_v35, %v970_v53  ;;  %v4555_v57 = vpop.f32.mrf.mxu0  ;;  %v4560_v58 = vpop.f32.mrf.mxu1 }
 0x4e4   :  { %v963_v59 = vpop.f32.mrf.mxu1  ;;  %v1018_v60 = vpop.f32.mrf.mxu0 }
 0x4e5   :  { %v1019_v61 = vadd.f32 %v5291_v11, %v1018_v60 }
 0x4e6   :  { %v4561_v62 = vpop.f32.mrf.mxu1  ;;  %v4568_v63 = vpop.f32.mrf.mxu0 }
 0x4e7   :  { %v5477_v13 = vpack.c.bf16 %v1019_v61, %v1019_v61 }
 0x4e8   :  { %v1021_v14 = vpop.f32.mrf.mxu0  ;;  %v1058_v15 = vpop.f32.mrf.mxu1 }
 0x4e9   :  { %v1059_v16 = vadd.f32 %v5296_v12, %v1058_v15  ;;  %1151 = vrot.lane.b32.xlu0 %v5477_v13, %s5097_s28 }
 0x4ea   :  { %v4569_v19 = vpop.f32.mrf.mxu0  ;;  %v4576_v20 = vpop.f32.mrf.mxu1 }
 0x4eb   :  { %v5482_v22 = vpack.c.bf16 %v1059_v16, %v1059_v16 }
 0x4ec   :  { %v1061_v25 = vpop.f32.mrf.mxu1  ;;  %v1098_v27 = vpop.f32.mrf.mxu0 }
 0x4ed   :  { %v1099_v28 = vadd.f32 %v5309_v24, %v1098_v27  ;;  %1200 = vrot.lane.b32.xlu1 %v5482_v22, %s5097_s28 }
 0x4ee   :  { %v4577_v11 = vpop.f32.mrf.mxu1  ;;  %v4584_v29 = vpop.f32.mrf.mxu0 }
 0x4ef   :  { %v5487_v30 = vpack.c.bf16 %v1099_v28, %v1099_v28 }
 0x4f0   :  { %v1101_v33 = vpop.f32.mrf.mxu0  ;;  %v1138_v12 = vpop.f32.mrf.mxu1 }
 0x4f1   :  { %v1139_v34 = vadd.f32 %v5314_v26, %v1138_v12  ;;  %1249 = vrot.lane.b32.xlu0 %v5487_v30, %s5097_s28 }
 0x4f2   :  { %v4585_v36 = vpop.f32.mrf.mxu0  ;;  %v4592_v37 = vpop.f32.mrf.mxu1 }
 0x4f3   :  { %v5492_v18 = vpack.c.bf16 %v1139_v34, %v1139_v34 }
 0x4f4   :  { %v1141_v38 = vpop.f32.mrf.mxu1 }
 0x4f5   :  { %1298 = vrot.lane.b32.xlu1 %v5492_v18, %s5097_s28 }
 0x4f6   :  { %v4593_v24 = vpop.f32.mrf.mxu1 }
 0x55b   :  { %v1152_v39 = vpop.permute.xlu0 %1151 }
 0x55c   :  { %v1157_v40 = vsel %vm343_vm2, %v1152_v39, 0 }
 0x55d   :  { %4595 = vmatpush3.bf16.xpose.msra.mxu0 %v1157_v40 }
 0x55e   :  { %4606 = vmatprep.subr.bf16.mxu0 %v5095_v1 }
 0x55f   :  { %v1201_v41 = vpop.permute.xlu1 %1200 }
 0x560   :  { %v1206_v26 = vsel %vm343_vm2, %v1201_v41, 0  ;;  %v5544_v41 = vld [vmem:[%s6174_s7] ss:$0 sm:$0xff] }
 0x561   :  { %4601 = vmatpush3.bf16.xpose.msra.mxu1 %v1206_v26  ;;  %v979_v26 = vadd.f32 %v5544_v41, %v5474_v21 }
 0x562   :  { %4612 = vmatprep.subr.bf16.mxu1 %v5095_v1 }
 0x563   :  { %v1250_v43 = vpop.permute.xlu0 %1249 }
 0x564   :  { %v1255_v44 = vsel %vm343_vm2, %v1250_v43, 0  ;;  %4597 = vmatmul.mubr.msk.bf16.vlgmr.msra.gmra.mxu0 %vm343_vm2, %v5477_v13  ;;  %v1770_v43 = vadd.f32 %v979_v26, %v5240_v5 }
 0x565   :  { %4607 = vmatpush3.bf16.xpose.msra.mxu0 %v1255_v44  ;;  %4608 = vmatprep.mubr.msk.bf16.mxu0 %vm5096_vm0, %v5095_v1 }
 0x566   :  { %4618 = vmatprep.subr.bf16.mxu0 %v5095_v1  ;;  %v1772_v44 = vsel %vm135_vm1, %v1770_v43, 0.0 }
 0x567   :  { %v1299_v45 = vpop.permute.xlu1 %1298 }
 0x568   :  { %v1304_v46 = vsel %vm343_vm2, %v1299_v45, 0  ;;  %4603 = vmatmul.mubr.msk.bf16.vlgmr.msra.gmra.mxu1 %vm343_vm2, %v5482_v22 }
 0x569   :  { %4613 = vmatpush3.bf16.xpose.msra.mxu1 %v1304_v46  ;;  %4614 = vmatprep.mubr.msk.bf16.mxu1 %vm5096_vm0, %v5095_v1 }
 0x56a   :  { %4624 = vmatprep.subr.bf16.mxu1 %v5095_v1 }
 0x56c   :  { %4609 = vmatmul.mubr.msk.bf16.vlgmr.msra.gmra.mxu0 %vm343_vm2, %v5487_v30 }
 0x56d   :  { %4620 = vmatprep.mubr.msk.bf16.mxu0 %vm5096_vm0, %v5095_v1 }
 0x570   :  { %4615 = vmatmul.mubr.msk.bf16.vlgmr.msra.gmra.mxu1 %vm343_vm2, %v5492_v18 }
 0x571   :  { %4626 = vmatprep.mubr.msk.bf16.mxu1 %vm5096_vm0, %v5095_v1 }
 0x624   :  { %v1193_v0 = vpop.f32.mrf.mxu0 }
 0x625   :  { %v1194_v2 = vadd.f32 %v4191_v47, %v1193_v0 }
 0x626   :  { %v4598_v3 = vpop.f32.mrf.mxu0 }
 0x627   :  { %v1346_v4 = vsel %vm343_vm2, %v1194_v2, -inf }
 0x628   :  { %v1242_v7 = vpop.f32.mrf.mxu1  ;;  %1347 = vmax.xlane.f32.xlu0 %v1346_v4  ;;  %v1196_v8 = vpop.f32.mrf.mxu0 }
 0x629   :  { %v1243_v9 = vadd.f32 %v4191_v47, %v1242_v7 }
 0x62a   :  { %v4599_v48 = vpop.f32.mrf.mxu0  ;;  %v4604_v10 = vpop.f32.mrf.mxu1 }
 0x62b   :  { %v1349_v49 = vsel %vm343_vm2, %v1243_v9, -inf }
 0x62c   :  { %1350 = vmax.xlane.f32.xlu1 %v1349_v49  ;;  %v1245_v50 = vpop.f32.mrf.mxu1  ;;  %v1291_v51 = vpop.f32.mrf.mxu0 }
 0x62d   :  { %v1292_v52 = vadd.f32 %v4191_v47, %v1291_v51 }
 0x62e   :  { %v4605_v53 = vpop.f32.mrf.mxu1  ;;  %v4610_v54 = vpop.f32.mrf.mxu0 }
 0x62f   :  { %v1352_v32 = vsel %vm343_vm2, %v1292_v52, -inf }
 0x630   :  { %v1340_v55 = vpop.f32.mrf.mxu1  ;;  %1353 = vmax.xlane.f32.xlu0 %v1352_v32  ;;  %v1294_v56 = vpop.f32.mrf.mxu0 }
 0x631   :  { %v1341_v35 = vadd.f32 %v4191_v47, %v1340_v55 }
 0x632   :  { %v4611_v57 = vpop.f32.mrf.mxu0  ;;  %v4616_v58 = vpop.f32.mrf.mxu1 }
 0x633   :  { %v1355_v59 = vsel %vm343_vm2, %v1341_v35, -inf }
 0x634   :  { %v1343_v60 = vpop.f32.mrf.mxu1  ;;  %1356 = vmax.xlane.f32.xlu0 %v1355_v59 }
 0x636   :  { %v4617_v61 = vpop.f32.mrf.mxu1 }
 0x63d   :  { %1394 = vrot.lane.b32.xlu1 %v5477_v13, %s5098_s24 }
 0x6b1   :  { %v1348_v62 = vpop.xlane.xlu0 %1347 }
 0x6b2   :  { %v1358_v63 = vsub.f32 %v1194_v2, %v1348_v62 }
 0x6b4   :  { %v1362_v14 = vmul.f32 1.442695, %v1358_v63 }
 0x6b5   :  { %v1351_v15 = vpop.xlane.xlu1 %1350 }
 0x6b6   :  { %5011 = vpow2.f32 %v1362_v14  ;;  %v1359_v16 = vsub.f32 %v1243_v9, %v1351_v15 }
 0x6b8   :  { %v1364_v19 = vmul.f32 1.442695, %v1359_v16 }
 0x6b9   :  { %v1395_v20 = vpop.permute.xlu1 %1394  ;;  %v1354_v25 = vpop.xlane.xlu0 %1353 }
 0x6ba   :  { %5013 = vpow2.f32 %v1364_v19  ;;  %v1400_v27 = vsel %vm590_vm3, %v1395_v20, 0  ;;  %v1360_v28 = vsub.f32 %v1292_v52, %v1354_v25 }
 0x6bb   :  { %4619 = vmatpush3.bf16.msra.mxu0 %v1400_v27 }
 0x6bc   :  { %v1366_v11 = vmul.f32 1.442695, %v1360_v28  ;;  %4630 = vmatprep.subr.bf16.mxu0 %v5095_v1 }
 0x6bd   :  { %v1357_v29 = vpop.xlane.xlu0 %1356 }
 0x6be   :  { %5015 = vpow2.f32 %v1366_v11  ;;  %v1361_v13 = vsub.f32 %v1341_v35, %v1357_v29  ;;  %v5598_v29 = vld [vmem:[%s6175_s8] sm:$0xff]  }
 0x6c0   :  { %v1368_v33 = vmul.f32 1.442695, %v1361_v13 }
 0x6c2   :  { %5017 = vpow2.f32 %v1368_v33 }
 0x6c3   :  { %v5012_v12 = vpop.eup %5011 }
 0x6c4   :  { %v1370_v34 = vsel %vm343_vm2, %v5012_v12, 0.0 }
 0x6c5   :  { %1371 = vadd.xlane.f32.xlu1 %v1370_v34 }
 0x6c7   :  { %v5014_v36 = vpop.eup %5013 }
 0x6c8   :  { %v1373_v37 = vsel %vm343_vm2, %v5014_v36, 0.0 }
 0x6c9   :  { %1374 = vadd.xlane.f32.xlu0 %v1373_v37 }
 0x6cb   :  { %v5016_v38 = vpop.eup %5015 }
 0x6cc   :  { %v1376_v24 = vsel %vm343_vm2, %v5016_v38, 0.0 }
 0x6cd   :  { %1377 = vadd.xlane.f32.xlu1 %v1376_v24 }
 0x6cf   :  { %v5018_v39 = vpop.eup %5017 }
 0x6d0   :  { %v1379_v40 = vsel %vm343_vm2, %v5018_v39, 0.0 }
 0x6d1   :  { %1380 = vadd.xlane.f32.xlu0 %v1379_v40  ;;  %v5623_v40 = vld [vmem:[%s6186_s19] ss:$0 sm:$0xff] }
 0x6de   :  { %1490 = vrot.lane.b32.xlu1 %v5487_v30, %s5098_s24 }
 0x6e2   :  { %1538 = vrot.lane.b32.xlu1 %v5492_v18, %s5098_s24 }
 0x6e7   :  { %1442 = vrot.lane.b32.xlu0 %v5482_v22, %s5098_s24  ;;  %s6202_s24 = sld [smem:[#allocation8_spill]] }
 0x706   :  { %1773 = vadd.xlane.f32.xlu0 %v1772_v44  ;;  %v5634_v44 = vld [vmem:[%s6175_s8 + $0x28] sm:$0xff]  }
 0x74e   :  { %v1372_v30 = vpop.xlane.xlu1 %1371 }
 0x74f   :  { %5019 = vrcp.f32 %v1372_v30  ;;  %v5639_v30 = vld [vmem:[%s6175_s8 + $0x38] sm:$0xff]  }
 0x752   :  { %v1375_v45 = vpop.xlane.xlu0 %1374 }
 0x753   :  { %5021 = vrcp.f32 %v1375_v45 }
 0x756   :  { %v1378_v18 = vpop.xlane.xlu1 %1377 }
 0x757   :  { %5023 = vrcp.f32 %v1378_v18  ;;  %v5650_v18 = vld [vmem:[%s6175_s8 + $0x20] sm:$0xff]  }
 0x75a   :  { %v1381_v22 = vpop.xlane.xlu0 %1380  ;;  %v1491_v47 = vpop.permute.xlu1 %1490 }
 0x75b   :  { %5025 = vrcp.f32 %v1381_v22  ;;  %v1496_v5 = vsel %vm590_vm3, %v1491_v47, 0  ;;  %v5655_v22 = vld [vmem:[%s6175_s8 + $0x30] sm:$0xff]   ;;  %v5673_v47 = vld [vmem:[%s6177_s10 + $0x18] sm:$0xff]  }
 0x75c   :  { %v5020_v46 = vpop.eup %5019 }
 0x75d   :  { %v1386_v0 = vmul.f32 %v5020_v46, %v5012_v12  ;;  %v5668_v46 = vld [vmem:[%s6177_s10 + $0x8] sm:$0xff]  }
 0x75e   :  { %v1443_v2 = vpop.permute.xlu0 %1442  ;;  %v1539_v8 = vpop.permute.xlu1 %1538 }
 0x75f   :  { %v1448_v3 = vsel %vm590_vm3, %v1443_v2, 0  ;;  %v1390_v21 = vpack.c.bf16 %v1386_v0, %v1386_v0  ;;  %v1544_v10 = vsel %vm590_vm3, %v1539_v8, 0  ;;  %v5684_v0 = vld [vmem:[%s6177_s10] sm:$0xff]   ;;  %v5689_v2 = vld [vmem:[%s6177_s10 + $0x10] sm:$0xff]  }
 0x760   :  { %v5022_v4 = vpop.eup %5021  ;;  %4625 = vmatpush3.bf16.msra.mxu1 %v1448_v3  ;;  %v69_v3 = vld [vmem:[%s6201_s0] sm:$0xff]  ;;  %v5726_v8 = vld [vmem:[%s6177_s10 + $0x30] sm:$0xff]  }
 0x761   :  { %4621 = vmatmul.mubr.msk.bf16.vlgmr.msra.gmra.mxu0 %vm343_vm2, %v1390_v21  ;;  %4636 = vmatprep.subr.bf16.mxu1 %v5095_v1  ;;  %v1387_v7 = vmul.f32 %v5022_v4, %v5014_v36  ;;  %v5609_v36 = vld [vmem:[%s6175_s8 + $0x10] sm:$0xff]   ;;  %v1861_v21 = vpack.c.bf16 %v69_v3, %v69_v3  ;;  %v5705_v4 = vld [vmem:[%s6177_s10 + $0x28] sm:$0xff]   ;;  %v5758_v3 = vld [vmem:[%s6178_s11 + $0x1] ss:$0 sm:$0xff] }
 0x762   :  { %4631 = vmatpush3.bf16.msra.mxu0 %v1496_v5  ;;  %4632 = vmatprep.mubr.msk.bf16.mxu0 %vm5096_vm0, %v5095_v1  ;;  %v5710_v5 = vld [vmem:[%s6177_s10 + $0x38] sm:$0xff]  }
 0x763   :  { %v1391_v9 = vpack.c.bf16 %v1387_v7, %v1387_v7  ;;  %4642 = vmatprep.subr.bf16.mxu0 %v5095_v1  ;;  %v5721_v7 = vld [vmem:[%s6177_s10 + $0x20] sm:$0xff]  }
 0x764   :  { %v5024_v48 = vpop.eup %5023 }
 0x765   :  { %4627 = vmatmul.mubr.msk.bf16.vlgmr.msra.gmra.mxu1 %vm343_vm2, %v1391_v9  ;;  %v1388_v49 = vmul.f32 %v5024_v48, %v5016_v38  ;;  %v5617_v38 = vld [vmem:[%s6185_s18] ss:$0 sm:$0xff] }
 0x766   :  { %4637 = vmatpush3.bf16.msra.mxu1 %v1544_v10  ;;  %4638 = vmatprep.mubr.msk.bf16.mxu1 %vm5096_vm0, %v5095_v1 }
 0x767   :  { %v1392_v50 = vpack.c.bf16 %v1388_v49, %v1388_v49  ;;  %4648 = vmatprep.subr.bf16.mxu1 %v5095_v1 }
 0x768   :  { %v5026_v51 = vpop.eup %5025 }
 0x769   :  { %4633 = vmatmul.mubr.msk.bf16.vlgmr.msra.gmra.mxu0 %vm343_vm2, %v1392_v50  ;;  %v1389_v52 = vmul.f32 %v5026_v51, %v5018_v39 }
 0x76a   :  { %4643 = vmatpush3.bf16.msra.mxu0 %v5388_v6  ;;  %4644 = vmatprep.mubr.msk.bf16.mxu0 %vm5096_vm0, %v5095_v1 }
 0x76b   :  { %v1393_v53 = vpack.c.bf16 %v1389_v52, %v1389_v52  ;;  %4654 = vmatprep.subr.bf16.mxu0 %v5095_v1 }
 0x76d   :  { %4639 = vmatmul.mubr.msk.bf16.vlgmr.msra.gmra.mxu1 %vm343_vm2, %v1393_v53 }
 0x76e   :  { %4649 = vmatpush3.bf16.msra.mxu1 %v5403_v17  ;;  %4650 = vmatprep.mubr.msk.bf16.mxu1 %vm5096_vm0, %v5095_v1 }
 0x76f   :  { %4660 = vmatprep.subr.bf16.mxu1 %v5095_v1 }
 0x78f   :  { %v1774_v54 = vpop.xlane.xlu0 %1773 }
 0x790   :  { %v1779_v32 = vmul.f32 0.03125, %v1774_v54 }
 0x792   :  { %v1781_v55 = vsub.f32 %v1770_v43, %v1779_v32 }
 0x794   :  { %v1783_v56 = vmul.f32 %v1781_v55, %v1781_v55 }
 0x796   :  { %v1785_v6 = vsel %vm135_vm1, %v1783_v56, 0.0 }
 0x797   :  { %1786 = vadd.xlane.f32.xlu1 %v1785_v6 }
 0x820   :  { %v1787_v35 = vpop.xlane.xlu1 %1786 }
 0x821   :  { %v1791_v57 = vmul.f32 0.03125, %v1787_v35  ;;  %v1436_v58 = vpop.f32.mrf.mxu0 }
 0x822   :  { %v1586_v59 = vpack.c.bf16 %v1436_v58, %v1436_v58 }
 0x823   :  { %v1793_v60 = vadd.f32 1e-05, %v1791_v57  ;;  %v4622_v61 = vpop.f32.mrf.mxu0 }
 0x824   :  { %4645 = vmatmul.mubr.msk.bf16.vlgmr.msra.gmra.mxu0 %vm343_vm2, %v1586_v59 }
 0x825   :  { %5027 = vrsqrt.f32 %v1793_v60  ;;  %v1439_v17 = vpop.f32.mrf.mxu0  ;;  %v1484_v62 = vpop.f32.mrf.mxu1  ;;  %4655 = vmatpush3.bf16.msra.mxu0 %v5411_v23  ;;  %4656 = vmatprep.mubr.msk.bf16.mxu0 %vm5096_vm0, %v5095_v1  ;;  %v5585_v23 = vld [vmem:[%s6175_s8 + $0x8] sm:$0xff]  }
 0x826   :  { %v1587_v63 = vpack.c.bf16 %v1484_v62, %v1484_v62  ;;  %4666 = vmatprep.subr.bf16.mxu0 %v5095_v1 }
 0x827   :  { %v4623_v14 = vpop.f32.mrf.mxu0  ;;  %v4628_v15 = vpop.f32.mrf.mxu1 }
 0x828   :  { %4651 = vmatmul.mubr.msk.bf16.vlgmr.msra.gmra.mxu1 %vm343_vm2, %v1587_v63 }
 0x829   :  { %v1487_v16 = vpop.f32.mrf.mxu1  ;;  %v1532_v19 = vpop.f32.mrf.mxu0  ;;  %4661 = vmatpush3.bf16.msra.mxu1 %v5421_v31  ;;  %4662 = vmatprep.mubr.msk.bf16.mxu1 %vm5096_vm0, %v5095_v1  ;;  %v5593_v31 = vld [vmem:[%s6175_s8 + $0x18] sm:$0xff]  }
 0x82a   :  { %v1588_v20 = vpack.c.bf16 %v1532_v19, %v1532_v19  ;;  %4674 = vmatprep.subr.bf16.mxu1 %v5095_v1 }
 0x82b   :  { %v4629_v25 = vpop.f32.mrf.mxu1  ;;  %v4634_v27 = vpop.f32.mrf.mxu0 }
 0x82c   :  { %4657 = vmatmul.mubr.msk.bf16.vlgmr.msra.gmra.mxu0 %vm343_vm2, %v1588_v20 }
 0x82d   :  { %v1535_v28 = vpop.f32.mrf.mxu0  ;;  %v1580_v11 = vpop.f32.mrf.mxu1  ;;  %4667 = vmatpush3.bf16.msra.mxu0 %v5585_v23  ;;  %4670 = vmatprep.mubr.msk.bf16.mxu0 %vm5096_vm0, %v5095_v1 }
 0x82e   :  { %v1589_v13 = vpack.c.bf16 %v1580_v11, %v1580_v11  ;;  %4668 = vmatprep.subr.bf16.mxu0 %v5095_v1 }
 0x82f   :  { %v4635_v33 = vpop.f32.mrf.mxu0  ;;  %v4640_v12 = vpop.f32.mrf.mxu1 }
 0x830   :  { %4663 = vmatmul.mubr.msk.bf16.vlgmr.msra.gmra.mxu1 %vm343_vm2, %v1589_v13 }
 0x831   :  { %v1583_v34 = vpop.f32.mrf.mxu1  ;;  %4675 = vmatpush3.bf16.msra.mxu1 %v5593_v31  ;;  %4669 = vmatpush3.bf16.msra.mxu0 %v5598_v29 }
 0x832   :  { %v5028_v37 = vpop.eup %5027  ;;  %4676 = vmatprep.subr.bf16.mxu1 %v5095_v1  ;;  %4678 = vmatprep.mubr.msk.bf16.mxu1 %vm5096_vm0, %v5095_v1 }
 0x833   :  { %v1797_v24 = vmul.f32 %v5028_v37, %v1781_v55  ;;  %v4641_v39 = vpop.f32.mrf.mxu1  ;;  %4682 = vmatprep.subr.bf16.mxu0 %v5095_v1 }
 0x835   :  { %4677 = vmatpush3.bf16.msra.mxu1 %v5609_v36  ;;  %v1805_v26 = vmul.f32 %v5617_v38, %v1797_v24 }
 0x836   :  { %4690 = vmatprep.subr.bf16.mxu1 %v5095_v1 }
 0x837   :  { %v5629_v43 = vadd.f32 %v5623_v40, %v1805_v26 }
 0x839   :  { %v1860_v45 = vpack.c.bf16 %v5629_v43, %v5629_v43 }
 0x83b   :  { %4671 = vmatmul.mubr.msk.bf16.vlgmr.msra.gmra.mxu0 %vm135_vm1, %v1860_v45  ;;  %4679 = vmatmul.mubr.msk.bf16.vlgmr.msra.gmra.mxu1 %vm135_vm1, %v1860_v45 }
 0x83c   :  { %4683 = vmatpush3.bf16.msra.mxu0 %v5634_v44  ;;  %4691 = vmatpush3.bf16.msra.mxu1 %v5639_v30 }
 0x83d   :  { %4684 = vmatprep.subr.bf16.mxu0 %v5095_v1  ;;  %4692 = vmatprep.subr.bf16.mxu1 %v5095_v1 }
 0x83e   :  { %4686 = vmatprep.mubr.msk.bf16.mxu0 %vm5096_vm0, %v5095_v1  ;;  %4694 = vmatprep.mubr.msk.bf16.mxu1 %vm5096_vm0, %v5095_v1 }
 0x840   :  { %4685 = vmatpush3.bf16.msra.mxu0 %v5650_v18  ;;  %4693 = vmatpush3.bf16.msra.mxu1 %v5655_v22 }
 0x841   :  { %4698 = vmatprep.subr.bf16.mxu0 %v5095_v1  ;;  %4706 = vmatprep.subr.bf16.mxu1 %v5095_v1 }
 0x843   :  { %4687 = vmatmul.mubr.msk.bf16.vlgmr.msra.gmra.mxu0 %vm135_vm1, %v1860_v45  ;;  %4695 = vmatmul.mubr.msk.bf16.vlgmr.msra.gmra.mxu1 %vm135_vm1, %v1860_v45  ;;  %v5753_v45 = vld [vmem:[%s6178_s11] ss:$0 sm:$0xff] }
 0x844   :  { %4699 = vmatpush3.bf16.msra.mxu0 %v5668_v46  ;;  %4707 = vmatpush3.bf16.msra.mxu1 %v5673_v47 }
 0x845   :  { %4700 = vmatprep.subr.bf16.mxu0 %v5095_v1  ;;  %4708 = vmatprep.subr.bf16.mxu1 %v5095_v1 }
 0x846   :  { %4702 = vmatprep.mubr.msk.bf16.mxu0 %vm5096_vm0, %v5095_v1  ;;  %4710 = vmatprep.mubr.msk.bf16.mxu1 %vm5096_vm0, %v5095_v1 }
 0x848   :  { %4701 = vmatpush3.bf16.msra.mxu0 %v5684_v0  ;;  %4709 = vmatpush3.bf16.msra.mxu1 %v5689_v2 }
 0x849   :  { %4714 = vmatprep.subr.bf16.mxu0 %v5095_v1  ;;  %4722 = vmatprep.subr.bf16.mxu1 %v5095_v1 }
 0x84b   :  { %4703 = vmatmul.mubr.msk.bf16.vlgmr.msra.gmra.mxu0 %vm135_vm1, %v1861_v21  ;;  %4711 = vmatmul.mubr.msk.bf16.vlgmr.msra.gmra.mxu1 %vm135_vm1, %v1861_v21 }
 0x84c   :  { %4715 = vmatpush3.bf16.msra.mxu0 %v5705_v4  ;;  %4723 = vmatpush3.bf16.msra.mxu1 %v5710_v5 }
 0x84d   :  { %4716 = vmatprep.subr.bf16.mxu0 %v5095_v1  ;;  %4724 = vmatprep.subr.bf16.mxu1 %v5095_v1 }
 0x84e   :  { %4718 = vmatprep.mubr.msk.bf16.mxu0 %vm5096_vm0, %v5095_v1  ;;  %4726 = vmatprep.mubr.msk.bf16.mxu1 %vm5096_vm0, %v5095_v1 }
 0x850   :  { %4717 = vmatpush3.bf16.msra.mxu0 %v5721_v7  ;;  %4725 = vmatpush3.bf16.msra.mxu1 %v5726_v8 }
 0x851   :  { %4730 = vmatprep.subr.bf16.mxu0 %v5095_v1  ;;  %4736 = vmatprep.subr.bf16.mxu1 %v5095_v1 }
 0x853   :  { %4719 = vmatmul.mubr.msk.bf16.vlgmr.msra.gmra.mxu0 %vm135_vm1, %v1861_v21  ;;  %4727 = vmatmul.mubr.msk.bf16.vlgmr.msra.gmra.mxu1 %vm135_vm1, %v1861_v21 }
 0x854   :  { %4732 = vmatprep.mubr.msk.bf16.mxu0 %vm5096_vm0, %v5095_v1  ;;  %4738 = vmatprep.mubr.msk.bf16.mxu1 %vm5096_vm0, %v5095_v1 }
 0x8e4   :  { %v1627_v9 = vpop.f32.mrf.mxu0 }
 0x8e5   :  { %v1762_v50 = vsel %vm135_vm1, %v1627_v9, 0.0 }
 0x8e6   :  { %v4646_v48 = vpop.f32.mrf.mxu0 }
 0x8e8   :  { %v1630_v10 = vpop.f32.mrf.mxu0  ;;  %v1670_v49 = vpop.f32.mrf.mxu1 }
 0x8e9   :  { %v1763_v51 = vsel %vm135_vm1, %v1670_v49, 0.0 }
 0x8ea   :  { %v1764_v52 = vadd.f32 %v1763_v51, %v1762_v50  ;;  %v4647_v53 = vpop.f32.mrf.mxu0  ;;  %v4652_v54 = vpop.f32.mrf.mxu1 }
 0x8eb   :  { %v5769_v53 = vld [vmem:[%s6176_s9] ss:$0 sm:$0xff]  ;;  %v5774_v54 = vld [vmem:[%s6176_s9 + $0x1] ss:$0 sm:$0xff] }
 0x8ec   :  { %v1673_v32 = vpop.f32.mrf.mxu1  ;;  %v1713_v55 = vpop.f32.mrf.mxu0 }
 0x8ed   :  { %v1765_v56 = vsel %vm135_vm1, %v1713_v55, 0.0 }
 0x8ee   :  { %v1766_v6 = vadd.f32 %v1765_v56, %v1764_v52  ;;  %v4653_v35 = vpop.f32.mrf.mxu1  ;;  %v4658_v57 = vpop.f32.mrf.mxu0 }
 0x8f0   :  { %v1716_v58 = vpop.f32.mrf.mxu0  ;;  %v1756_v59 = vpop.f32.mrf.mxu1 }
 0x8f1   :  { %v1767_v60 = vsel %vm135_vm1, %v1756_v59, 0.0  ;;  %v5783_v58 = vld [vmem:[%s6178_s11 + $0x2] ss:$0 sm:$0xff]  ;;  %v5788_v59 = vld [vmem:[%s6178_s11 + $0x3] ss:$0 sm:$0xff] }
 0x8f2   :  { %v5748_v61 = vadd.f32 %v1767_v60, %v1766_v6  ;;  %v4659_v17 = vpop.f32.mrf.mxu0  ;;  %v4664_v62 = vpop.f32.mrf.mxu1 }
 0x8f4   :  { %v1759_v63 = vpop.f32.mrf.mxu1 }
 0x8f6   :  { %v4665_v14 = vpop.f32.mrf.mxu1 }
 0x8fb   :  { %v1935_v15 = vpop.f32.mrf.mxu0  ;;  %v1987_v16 = vpop.f32.mrf.mxu1 }
 0x8fc   :  { %v1936_v60 = vadd.f32 %v5769_v53, %v1935_v15  ;;  %v1988_v17 = vadd.f32 %v5774_v54, %v1987_v16  ;;  %v5803_v15 = vld [vmem:[%s6176_s9 + $0x2] ss:$0 sm:$0xff]  ;;  %v5808_v16 = vld [vmem:[%s6176_s9 + $0x3] ss:$0 sm:$0xff] }
 0x8fd   :  { %v4672_v19 = vpop.f32.mrf.mxu0  ;;  %v4680_v20 = vpop.f32.mrf.mxu1 }
 0x8ff   :  { %v1938_v25 = vpop.f32.mrf.mxu0  ;;  %v1990_v27 = vpop.f32.mrf.mxu1 }
 0x900   :  { %v2333_v27 = vpack.c.bf16 %v1936_v60, %v1936_v60 }
 0x901   :  { %v4673_v28 = vpop.f32.mrf.mxu0  ;;  %v4681_v11 = vpop.f32.mrf.mxu1 }
 0x902   :  { %v2334_v28 = vpack.c.bf16 %v1988_v17, %v1988_v17 }
 0x903   :  { %v2039_v13 = vpop.f32.mrf.mxu0  ;;  %v2091_v33 = vpop.f32.mrf.mxu1 }
 0x905   :  { %v4688_v12 = vpop.f32.mrf.mxu0  ;;  %v4696_v34 = vpop.f32.mrf.mxu1 }
 0x907   :  { %v2042_v37 = vpop.f32.mrf.mxu0  ;;  %v2094_v24 = vpop.f32.mrf.mxu1 }
 0x909   :  { %v4689_v39 = vpop.f32.mrf.mxu0  ;;  %v4697_v26 = vpop.f32.mrf.mxu1 }
 0x90b   :  { %v2170_v21 = vpop.f32.mrf.mxu0  ;;  %v2222_v9 = vpop.f32.mrf.mxu1 }
 0x90c   :  { %v2171_v48 = vadd.f32 %v5753_v45, %v2170_v21  ;;  %v2223_v10 = vadd.f32 %v5758_v3, %v2222_v9  ;;  %v2040_v9 = vadd.f32 %v5803_v15, %v2039_v13  ;;  %v2332_v13 = vld [vmem:[%s6202_s24] sm:$0xff] }
 0x90d   :  { %v4704_v49 = vpop.f32.mrf.mxu0  ;;  %v4712_v50 = vpop.f32.mrf.mxu1 }
 0x90e   :  { %v5762_v51 = vpack.c.bf16 %v2171_v48, %v2171_v48  ;;  %v5764_v52 = vpack.c.bf16 %v2223_v10, %v2223_v10  ;;  %v2092_v48 = vadd.f32 %v5808_v16, %v2091_v33  ;;  %v2335_v10 = vpack.c.bf16 %v2040_v9, %v2040_v9 }
 0x90f   :  { %v2173_v32 = vpop.f32.mrf.mxu0  ;;  %v2225_v55 = vpop.f32.mrf.mxu1 }
 0x910   :  { %v2345_v56 = vsel %vm343_vm2, %v5762_v51, 0  ;;  %v2391_v6 = vsel %vm343_vm2, %v5764_v52, 0  ;;  %v2336_v49 = vpack.c.bf16 %v2092_v48, %v2092_v48 }
 0x911   :  { %v4705_v35 = vpop.f32.mrf.mxu0  ;;  %v4713_v57 = vpop.f32.mrf.mxu1  ;;  %4731 = vmatpush3.bf16.xpose.msra.mxu0 %v2345_v56  ;;  %4737 = vmatpush3.bf16.xpose.msra.mxu1 %v2391_v6 }
 0x912   :  { %4742 = vmatprep.subr.bf16.mxu0 %v5095_v1  ;;  %4748 = vmatprep.subr.bf16.mxu1 %v5095_v1 }
 0x913   :  { %v2274_v62 = vpop.f32.mrf.mxu0  ;;  %v2326_v63 = vpop.f32.mrf.mxu1 }
 0x914   :  { %v2275_v14 = vadd.f32 %v5783_v58, %v2274_v62  ;;  %v2327_v19 = vadd.f32 %v5788_v59, %v2326_v63 }
 0x915   :  { %v4720_v20 = vpop.f32.mrf.mxu0  ;;  %v4728_v25 = vpop.f32.mrf.mxu1 }
 0x916   :  { %v5796_v11 = vpack.c.bf16 %v2275_v14, %v2275_v14  ;;  %v5798_v12 = vpack.c.bf16 %v2327_v19, %v2327_v19 }
 0x917   :  { %v2277_v34 = vpop.f32.mrf.mxu0  ;;  %v2329_v37 = vpop.f32.mrf.mxu1 }
 0x918   :  { %v2437_v24 = vsel %vm343_vm2, %v5796_v11, 0  ;;  %v2483_v39 = vsel %vm343_vm2, %v5798_v12, 0  ;;  %4733 = vmatmul.mubr.msk.bf16.vlgmr.msra.gmra.mxu0 %vm343_vm2, %v2333_v27  ;;  %4739 = vmatmul.mubr.msk.bf16.vlgmr.msra.gmra.mxu1 %vm343_vm2, %v2334_v28 }
 0x919   :  { %v4721_v26 = vpop.f32.mrf.mxu0  ;;  %v4729_v21 = vpop.f32.mrf.mxu1  ;;  %4743 = vmatpush3.bf16.xpose.msra.mxu0 %v2437_v24  ;;  %4749 = vmatpush3.bf16.xpose.msra.mxu1 %v2483_v39 }
 0x91a   :  { %4744 = vmatprep.mubr.msk.bf16.mxu0 %vm5096_vm0, %v5095_v1  ;;  %4750 = vmatprep.mubr.msk.bf16.mxu1 %vm5096_vm0, %v5095_v1 }
 0x91b   :  { %4754 = vmatprep.subr.bf16.mxu0 %v5095_v1  ;;  %4760 = vmatprep.subr.bf16.mxu1 %v5095_v1 }
 0x920   :  { %4745 = vmatmul.mubr.msk.bf16.vlgmr.msra.gmra.mxu0 %vm343_vm2, %v2335_v10  ;;  %4751 = vmatmul.mubr.msk.bf16.vlgmr.msra.gmra.mxu1 %vm343_vm2, %v2336_v49 }
 0x921   :  { %4756 = vmatprep.mubr.msk.bf16.mxu0 %vm5096_vm0, %v5095_v1  ;;  %4762 = vmatprep.mubr.msk.bf16.mxu1 %vm5096_vm0, %v5095_v1 }
 0x9d8   :  { %v2381_v33 = vpop.f32.mrf.mxu0  ;;  %v2427_v50 = vpop.f32.mrf.mxu1 }
 0x9d9   :  { %v2382_v32 = vadd.f32 %v2381_v33, %v2332_v13  ;;  %v2428_v6 = vadd.f32 %v2427_v50, %v2332_v13 }
 0x9da   :  { %v4734_v55 = vpop.f32.mrf.mxu0  ;;  %v4740_v56 = vpop.f32.mrf.mxu1 }
 0x9db   :  { %v2525_v35 = vsel %vm343_vm2, %v2382_v32, -inf  ;;  %v2528_v63 = vsel %vm343_vm2, %v2428_v6, -inf }
 0x9dc   :  { %v2430_v57 = vpop.f32.mrf.mxu1  ;;  %2526 = vmax.xlane.f32.xlu0 %v2525_v35  ;;  %v2384_v60 = vpop.f32.mrf.mxu0 }
 0x9de   :  { %v4735_v17 = vpop.f32.mrf.mxu0  ;;  %v4741_v62 = vpop.f32.mrf.mxu1 }
 0x9e0   :  { %v2519_v14 = vpop.f32.mrf.mxu1  ;;  %2529 = vmax.xlane.f32.xlu0 %v2528_v63  ;;  %v2473_v19 = vpop.f32.mrf.mxu0 }
 0x9e1   :  { %v2520_v20 = vadd.f32 %v2519_v14, %v2332_v13  ;;  %v2474_v25 = vadd.f32 %v2473_v19, %v2332_v13 }
 0x9e2   :  { %v4746_v27 = vpop.f32.mrf.mxu0  ;;  %v4752_v28 = vpop.f32.mrf.mxu1 }
 0x9e3   :  { %v2534_v34 = vsel %vm343_vm2, %v2520_v20, -inf  ;;  %v2531_v37 = vsel %vm343_vm2, %v2474_v25, -inf  ;;  %v1769_v27 = vadd.f32 %v5544_v41, %v5748_v61 }
 0x9e4   :  { %v2522_v24 = vpop.f32.mrf.mxu1  ;;  %2535 = vmax.xlane.f32.xlu0 %v2534_v34  ;;  %2532 = vmax.xlane.f32.xlu1 %v2531_v37  ;;  %v2476_v39 = vpop.f32.mrf.mxu0 }
 0x9e5   :  { %v1771_v28 = vadd.f32 %v1769_v27, %v5436_v42 }
 0x9e6   :  { %v4747_v26 = vpop.f32.mrf.mxu0  ;;  %v4753_v21 = vpop.f32.mrf.mxu1 }
 0x9e7   :  { %v1775_v34 = vsel %vm135_vm1, %v1771_v28, 0.0 }
 0x9f5   :  { %2574 = vrot.lane.b32.xlu1 %v5762_v51, %s5097_s28 }
 0xa65   :  { %v2527_v9 = vpop.xlane.xlu0 %2526 }
 0xa66   :  { %v2537_v48 = vsub.f32 %v2382_v32, %v2527_v9 }
 0xa68   :  { %v2541_v10 = vmul.f32 1.442695, %v2537_v48 }
 0xa69   :  { %v2530_v49 = vpop.xlane.xlu0 %2529 }
 0xa6a   :  { %5029 = vpow2.f32 %v2541_v10  ;;  %v2538_v13 = vsub.f32 %v2428_v6, %v2530_v49 }
 0xa6c   :  { %v2543_v33 = vmul.f32 1.442695, %v2538_v13 }
 0xa6d   :  { %v2536_v50 = vpop.xlane.xlu0 %2535  ;;  %v2533_v55 = vpop.xlane.xlu1 %2532 }
 0xa6e   :  { %5031 = vpow2.f32 %v2543_v33  ;;  %v2540_v56 = vsub.f32 %v2520_v20, %v2536_v50  ;;  %v2539_v35 = vsub.f32 %v2474_v25, %v2533_v55 }
 0xa70   :  { %v2547_v57 = vmul.f32 1.442695, %v2540_v56  ;;  %v2545_v60 = vmul.f32 1.442695, %v2539_v35 }
 0xa71   :  { %v2575_v17 = vpop.permute.xlu1 %2574 }
 0xa72   :  { %5033 = vpow2.f32 %v2547_v57  ;;  %v2580_v62 = vsel %vm590_vm3, %v2575_v17, 0 }
 0xa73   :  { %5035 = vpow2.f32 %v2545_v60  ;;  %4755 = vmatpush3.bf16.msra.mxu0 %v2580_v62 }
 0xa74   :  { %4766 = vmatprep.subr.bf16.mxu0 %v5095_v1 }
 0xa77   :  { %v5030_v51 = vpop.eup %5029 }
 0xa78   :  { %v2549_v32 = vsel %vm343_vm2, %v5030_v51, 0.0 }
 0xa79   :  { %2550 = vadd.xlane.f32.xlu1 %v2549_v32 }
 0xa7b   :  { %v5032_v6 = vpop.eup %5031 }
 0xa7c   :  { %v2552_v63 = vsel %vm343_vm2, %v5032_v6, 0.0 }
 0xa7d   :  { %2553 = vadd.xlane.f32.xlu0 %v2552_v63 }
 0xa7f   :  { %v5034_v14 = vpop.eup %5033 }
 0xa80   :  { %v5036_v19 = vpop.eup %5035  ;;  %v2558_v20 = vsel %vm343_vm2, %v5034_v14, 0.0 }
 0xa81   :  { %2559 = vadd.xlane.f32.xlu0 %v2558_v20  ;;  %v2555_v25 = vsel %vm343_vm2, %v5036_v19, 0.0 }
 0xa82   :  { %2556 = vadd.xlane.f32.xlu1 %v2555_v25 }
 0xa93   :  { %2672 = vrot.lane.b32.xlu1 %v5796_v11, %s5097_s28 }
 0xa97   :  { %2721 = vrot.lane.b32.xlu1 %v5798_v12, %s5097_s28  ;;  %2623 = vrot.lane.b32.xlu0 %v5764_v52, %s5097_s28 }
 0xab6   :  { %1776 = vadd.xlane.f32.xlu0 %v1775_v34 }
 0xb02   :  { %v2551_v37 = vpop.xlane.xlu1 %2550 }
 0xb03   :  { %5037 = vrcp.f32 %v2551_v37 }
 0xb06   :  { %v2554_v24 = vpop.xlane.xlu0 %2553 }
 0xb07   :  { %5039 = vrcp.f32 %v2554_v24 }
 0xb0a   :  { %v2560_v39 = vpop.xlane.xlu0 %2559 }
 0xb0b   :  { %5041 = vrcp.f32 %v2560_v39  ;;  %v2557_v11 = vpop.xlane.xlu1 %2556 }
 0xb0c   :  { %5043 = vrcp.f32 %v2557_v11  ;;  %v1858_v11 = vld [vmem:[%s6179_s12 + $0xc] sm:$0xf] }
 0xb0e   :  { %v2624_v12 = vpop.permute.xlu0 %2623 }
 0xb0f   :  { %v2629_v26 = vsel %vm590_vm3, %v2624_v12, 0  ;;  %v2673_v21 = vpop.permute.xlu1 %2672 }
 0xb10   :  { %v5038_v52 = vpop.eup %5037  ;;  %4761 = vmatpush3.bf16.msra.mxu1 %v2629_v26  ;;  %v2678_v9 = vsel %vm590_vm3, %v2673_v21, 0  ;;  %v5904_v21 = vsel %vm590_vm3, %v1858_v11, 0 }
 0xb11   :  { %v2565_v41 = vmul.f32 %v5038_v52, %v5030_v51  ;;  %4772 = vmatprep.subr.bf16.mxu1 %v5095_v1 }
 0xb13   :  { %v2569_v42 = vpack.c.bf16 %v2565_v41, %v2565_v41  ;;  %v2722_v10 = vpop.permute.xlu1 %2721 }
 0xb14   :  { %v5040_v61 = vpop.eup %5039  ;;  %v2727_v50 = vsel %vm590_vm3, %v2722_v10, 0 }
 0xb15   :  { %4757 = vmatmul.mubr.msk.bf16.vlgmr.msra.gmra.mxu0 %vm343_vm2, %v2569_v42  ;;  %v2566_v48 = vmul.f32 %v5040_v61, %v5032_v6  ;;  %v1855_v6 = vld [vmem:[%s6179_s12] sm:$0xf] }
 0xb16   :  { %4767 = vmatpush3.bf16.msra.mxu0 %v2678_v9  ;;  %4768 = vmatprep.mubr.msk.bf16.mxu0 %vm5096_vm0, %v5095_v1  ;;  %v5878_v63 = vsel %vm590_vm3, %v1855_v6, 0 }
 0xb17   :  { %v2570_v49 = vpack.c.bf16 %v2566_v48, %v2566_v48  ;;  %4778 = vmatprep.subr.bf16.mxu0 %v5095_v1 }
 0xb18   :  { %v5042_v13 = vpop.eup %5041 }
 0xb19   :  { %v5044_v33 = vpop.eup %5043  ;;  %4763 = vmatmul.mubr.msk.bf16.vlgmr.msra.gmra.mxu1 %vm343_vm2, %v2570_v49  ;;  %v2568_v56 = vmul.f32 %v5042_v13, %v5034_v14  ;;  %v1856_v14 = vld [vmem:[%s6179_s12 + $0x4] sm:$0xf] }
 0xb1a   :  { %4773 = vmatpush3.bf16.msra.mxu1 %v2727_v50  ;;  %v2567_v55 = vmul.f32 %v5044_v33, %v5036_v19  ;;  %4774 = vmatprep.mubr.msk.bf16.mxu1 %vm5096_vm0, %v5095_v1  ;;  %v5886_v19 = vsel %vm590_vm3, %v1856_v14, 0 }
 0xb1b   :  { %4784 = vmatprep.subr.bf16.mxu1 %v5095_v1  ;;  %v2572_v57 = vpack.c.bf16 %v2568_v56, %v2568_v56 }
 0xb1c   :  { %v2571_v35 = vpack.c.bf16 %v2567_v55, %v2567_v55 }
 0xb1e   :  { %4769 = vmatmul.mubr.msk.bf16.vlgmr.msra.gmra.mxu0 %vm343_vm2, %v2571_v35 }
 0xb1f   :  { %4780 = vmatprep.mubr.msk.bf16.mxu0 %vm5096_vm0, %v5095_v1  ;;  %4779 = vmatpush3.bf16.msra.mxu0 %v5878_v63 }
 0xb20   :  { %4790 = vmatprep.subr.bf16.mxu0 %v5095_v1 }
 0xb21   :  { %4775 = vmatmul.mubr.msk.bf16.vlgmr.msra.gmra.mxu1 %vm343_vm2, %v2572_v57 }
 0xb22   :  { %4786 = vmatprep.mubr.msk.bf16.mxu1 %vm5096_vm0, %v5095_v1  ;;  %4785 = vmatpush3.bf16.msra.mxu1 %v5886_v19 }
 0xb23   :  { %4796 = vmatprep.subr.bf16.mxu1 %v5095_v1 }
 0xb3f   :  { %v1777_v60 = vpop.xlane.xlu0 %1776 }
 0xb40   :  { %v1780_v17 = vmul.f32 0.03125, %v1777_v60 }
 0xb42   :  { %v1782_v62 = vsub.f32 %v1771_v28, %v1780_v17  ;;  %v1857_v28 = vld [vmem:[%s6179_s12 + $0x8] sm:$0xf] }
 0xb43   :  { %v5894_v24 = vsel %vm590_vm3, %v1857_v28, 0 }
 0xb44   :  { %v1784_v51 = vmul.f32 %v1782_v62, %v1782_v62 }
 0xb46   :  { %v1788_v32 = vsel %vm135_vm1, %v1784_v51, 0.0 }
 0xb47   :  { %1789 = vadd.xlane.f32.xlu1 %v1788_v32 }
 0xbd0   :  { %v1790_v20 = vpop.xlane.xlu1 %1789 }
 0xbd1   :  { %v1792_v25 = vmul.f32 0.03125, %v1790_v20 }
 0xbd3   :  { %v1794_v27 = vadd.f32 1e-05, %v1792_v25 }
 0xbd5   :  { %5045 = vrsqrt.f32 %v1794_v27  ;;  %v2616_v34 = vpop.f32.mrf.mxu0 }
 0xbd6   :  { %v2769_v37 = vpack.c.bf16 %v2616_v34, %v2616_v34 }
 0xbd7   :  { %v4758_v39 = vpop.f32.mrf.mxu0 }
 0xbd8   :  { %4781 = vmatmul.mubr.msk.bf16.vlgmr.msra.gmra.mxu0 %vm343_vm2, %v2769_v37 }
 0xbd9   :  { %v2619_v12 = vpop.f32.mrf.mxu0  ;;  %v2665_v26 = vpop.f32.mrf.mxu1  ;;  %4791 = vmatpush3.bf16.msra.mxu0 %v5894_v24  ;;  %4792 = vmatprep.mubr.msk.bf16.mxu0 %vm5096_vm0, %v5095_v1 }
 0xbda   :  { %v2770_v52 = vpack.c.bf16 %v2665_v26, %v2665_v26  ;;  %4802 = vmatprep.subr.bf16.mxu0 %v5095_v1 }
 0xbdb   :  { %v4759_v41 = vpop.f32.mrf.mxu0  ;;  %v4764_v42 = vpop.f32.mrf.mxu1 }
 0xbdc   :  { %4787 = vmatmul.mubr.msk.bf16.vlgmr.msra.gmra.mxu1 %vm343_vm2, %v2770_v52 }
 0xbdd   :  { %v2668_v61 = vpop.f32.mrf.mxu1  ;;  %4797 = vmatpush3.bf16.msra.mxu1 %v5904_v21  ;;  %4798 = vmatprep.mubr.msk.bf16.mxu1 %vm5096_vm0, %v5095_v1 }
 0xbde   :  { %v2714_v9 = vpop.f32.mrf.mxu0  ;;  %4810 = vmatprep.subr.bf16.mxu1 %v5095_v1 }
 0xbdf   :  { %v2771_v48 = vpack.c.bf16 %v2714_v9, %v2714_v9  ;;  %v4765_v10 = vpop.f32.mrf.mxu1 }
 0xbe0   :  { %v4770_v49 = vpop.f32.mrf.mxu0 }
 0xbe1   :  { %4793 = vmatmul.mubr.msk.bf16.vlgmr.msra.gmra.mxu0 %vm343_vm2, %v2771_v48  ;;  %v2763_v13 = vpop.f32.mrf.mxu1 }
 0xbe2   :  { %v5046_v33 = vpop.eup %5045  ;;  %v2717_v50 = vpop.f32.mrf.mxu0  ;;  %v2772_v55 = vpack.c.bf16 %v2763_v13, %v2763_v13  ;;  %4803 = vmatpush3.bf16.msra.mxu0 %v5585_v23  ;;  %4806 = vmatprep.mubr.msk.bf16.mxu0 %vm5096_vm0, %v5095_v1 }
 0xbe3   :  { %v1798_v56 = vmul.f32 %v5046_v33, %v1782_v62  ;;  %v4776_v35 = vpop.f32.mrf.mxu1  ;;  %4804 = vmatprep.subr.bf16.mxu0 %v5095_v1 }
 0xbe4   :  { %v4771_v57 = vpop.f32.mrf.mxu0  ;;  %4799 = vmatmul.mubr.msk.bf16.vlgmr.msra.gmra.mxu1 %vm343_vm2, %v2772_v55 }
 0xbe5   :  { %v2766_v60 = vpop.f32.mrf.mxu1  ;;  %4811 = vmatpush3.bf16.msra.mxu1 %v5593_v31  ;;  %v1806_v17 = vmul.f32 %v5617_v38, %v1798_v56  ;;  %4814 = vmatprep.mubr.msk.bf16.mxu1 %vm5096_vm0, %v5095_v1 }
 0xbe6   :  { %4805 = vmatpush3.bf16.msra.mxu0 %v5598_v29  ;;  %4812 = vmatprep.subr.bf16.mxu1 %v5095_v1  ;;  %v70_v29 = vld [vmem:[%s6201_s0 + $0x8] sm:$0xff] }
 0xbe7   :  { %v4777_v23 = vpop.f32.mrf.mxu1  ;;  %v5925_v62 = vadd.f32 %v5623_v40, %v1806_v17  ;;  %4818 = vmatprep.subr.bf16.mxu0 %v5095_v1 }
 0xbe9   :  { %4813 = vmatpush3.bf16.msra.mxu1 %v5609_v36  ;;  %v2971_v31 = vpack.c.bf16 %v5925_v62, %v5925_v62  ;;  %v2972_v36 = vpack.c.bf16 %v70_v29, %v70_v29 }
 0xbea   :  { %4826 = vmatprep.subr.bf16.mxu1 %v5095_v1 }
 0xbeb   :  { %4807 = vmatmul.mubr.msk.bf16.vlgmr.msra.gmra.mxu0 %vm135_vm1, %v2971_v31 }
 0xbec   :  { %4815 = vmatmul.mubr.msk.bf16.vlgmr.msra.gmra.mxu1 %vm135_vm1, %v2971_v31  ;;  %4819 = vmatpush3.bf16.msra.mxu0 %v5634_v44 }
 0xbed   :  { %4827 = vmatpush3.bf16.msra.mxu1 %v5639_v30  ;;  %4820 = vmatprep.subr.bf16.mxu0 %v5095_v1 }
 0xbee   :  { %4828 = vmatprep.subr.bf16.mxu1 %v5095_v1  ;;  %4822 = vmatprep.mubr.msk.bf16.mxu0 %vm5096_vm0, %v5095_v1 }
 0xbef   :  { %4830 = vmatprep.mubr.msk.bf16.mxu1 %vm5096_vm0, %v5095_v1 }
 0xbf0   :  { %4821 = vmatpush3.bf16.msra.mxu0 %v5650_v18 }
 0xbf1   :  { %4829 = vmatpush3.bf16.msra.mxu1 %v5655_v22  ;;  %4834 = vmatprep.subr.bf16.mxu0 %v5095_v1 }
 0xbf2   :  { %4842 = vmatprep.subr.bf16.mxu1 %v5095_v1 }
 0xbf3   :  { %4823 = vmatmul.mubr.msk.bf16.vlgmr.msra.gmra.mxu0 %vm135_vm1, %v2971_v31 }
 0xbf4   :  { %4831 = vmatmul.mubr.msk.bf16.vlgmr.msra.gmra.mxu1 %vm135_vm1, %v2971_v31  ;;  %4835 = vmatpush3.bf16.msra.mxu0 %v5668_v46 }
 0xbf5   :  { %4843 = vmatpush3.bf16.msra.mxu1 %v5673_v47  ;;  %4836 = vmatprep.subr.bf16.mxu0 %v5095_v1 }
 0xbf6   :  { %4844 = vmatprep.subr.bf16.mxu1 %v5095_v1  ;;  %4838 = vmatprep.mubr.msk.bf16.mxu0 %vm5096_vm0, %v5095_v1 }
 0xbf7   :  { %4846 = vmatprep.mubr.msk.bf16.mxu1 %vm5096_vm0, %v5095_v1 }
 0xbf8   :  { %4837 = vmatpush3.bf16.msra.mxu0 %v5684_v0 }
 0xbf9   :  { %4845 = vmatpush3.bf16.msra.mxu1 %v5689_v2  ;;  %4850 = vmatprep.subr.bf16.mxu0 %v5095_v1 }
 0xbfa   :  { %4858 = vmatprep.subr.bf16.mxu1 %v5095_v1 }
 0xbfb   :  { %4839 = vmatmul.mubr.msk.bf16.vlgmr.msra.gmra.mxu0 %vm135_vm1, %v2972_v36 }
 0xbfc   :  { %4847 = vmatmul.mubr.msk.bf16.vlgmr.msra.gmra.mxu1 %vm135_vm1, %v2972_v36  ;;  %4851 = vmatpush3.bf16.msra.mxu0 %v5705_v4 }
 0xbfd   :  { %4859 = vmatpush3.bf16.msra.mxu1 %v5710_v5  ;;  %4852 = vmatprep.subr.bf16.mxu0 %v5095_v1 }
 0xbfe   :  { %4860 = vmatprep.subr.bf16.mxu1 %v5095_v1  ;;  %4854 = vmatprep.mubr.msk.bf16.mxu0 %vm5096_vm0, %v5095_v1 }
 0xbff   :  { %4862 = vmatprep.mubr.msk.bf16.mxu1 %vm5096_vm0, %v5095_v1 }
 0xc00   :  { %4853 = vmatpush3.bf16.msra.mxu0 %v5721_v7 }
 0xc01   :  { %4861 = vmatpush3.bf16.msra.mxu1 %v5726_v8  ;;  %4866 = vmatprep.subr.bf16.mxu0 %v5095_v1 }
 0xc02   :  { %4872 = vmatprep.subr.bf16.mxu1 %v5095_v1 }
 0xc03   :  { %4855 = vmatmul.mubr.msk.bf16.vlgmr.msra.gmra.mxu0 %vm135_vm1, %v2972_v36 }
 0xc04   :  { %4863 = vmatmul.mubr.msk.bf16.vlgmr.msra.gmra.mxu1 %vm135_vm1, %v2972_v36  ;;  %4868 = vmatprep.mubr.msk.bf16.mxu0 %vm5096_vm0, %v5095_v1 }
 0xc05   :  { %4874 = vmatprep.mubr.msk.bf16.mxu1 %vm5096_vm0, %v5095_v1 }
 0xc98   :  { %v2813_v38 = vpop.f32.mrf.mxu0 }
 0xc99   :  { %v2957_v18 = vsel %vm135_vm1, %v2813_v38, 0.0 }
 0xc9a   :  { %v4782_v40 = vpop.f32.mrf.mxu0 }
 0xc9c   :  { %v2816_v44 = vpop.f32.mrf.mxu0  ;;  %v2859_v30 = vpop.f32.mrf.mxu1 }
 0xc9d   :  { %v2958_v22 = vsel %vm135_vm1, %v2859_v30, 0.0 }
 0xc9e   :  { %v2959_v46 = vadd.f32 %v2958_v22, %v2957_v18  ;;  %v4783_v47 = vpop.f32.mrf.mxu0  ;;  %v4788_v0 = vpop.f32.mrf.mxu1 }
 0xca0   :  { %v2862_v2 = vpop.f32.mrf.mxu1 }
 0xca1   :  { %v2905_v4 = vpop.f32.mrf.mxu0 }
 0xca2   :  { %v2960_v5 = vsel %vm135_vm1, %v2905_v4, 0.0  ;;  %v4789_v7 = vpop.f32.mrf.mxu1 }
 0xca3   :  { %v2961_v8 = vadd.f32 %v2960_v5, %v2959_v46  ;;  %v4794_v51 = vpop.f32.mrf.mxu0 }
 0xca4   :  { %v2951_v32 = vpop.f32.mrf.mxu1 }
 0xca5   :  { %v2908_v6 = vpop.f32.mrf.mxu0  ;;  %v2962_v14 = vsel %vm135_vm1, %v2951_v32, 0.0 }
 0xca6   :  { %v5987_v20 = vadd.f32 %v2962_v14, %v2961_v8  ;;  %v4800_v25 = vpop.f32.mrf.mxu1 }
 0xca7   :  { %v4795_v27 = vpop.f32.mrf.mxu0 }
 0xca8   :  { %v2954_v28 = vpop.f32.mrf.mxu1 }
 0xcaa   :  { %v4801_v34 = vpop.f32.mrf.mxu1 }
 0xcab   :  { %v3010_v37 = vpop.f32.mrf.mxu0 }
 0xcac   :  { %v3050_v39 = vpop.f32.mrf.mxu1 }
 0xcad   :  { %v4808_v11 = vpop.f32.mrf.mxu0 }
 0xcae   :  { %v4816_v12 = vpop.f32.mrf.mxu1 }
 0xcaf   :  { %v3013_v26 = vpop.f32.mrf.mxu0 }
 0xcb0   :  { %v3053_v52 = vpop.f32.mrf.mxu1 }
 0xcb1   :  { %v4809_v41 = vpop.f32.mrf.mxu0 }
 0xcb2   :  { %v4817_v42 = vpop.f32.mrf.mxu1 }
 0xcb3   :  { %v3090_v61 = vpop.f32.mrf.mxu0 }
 0xcb4   :  { %v3130_v9 = vpop.f32.mrf.mxu1 }
 0xcb5   :  { %v4824_v48 = vpop.f32.mrf.mxu0  ;;  %v3131_v14 = vadd.f32 %v5808_v16, %v3130_v9 }
 0xcb6   :  { %v4832_v10 = vpop.f32.mrf.mxu1 }
 0xcb7   :  { %v3093_v49 = vpop.f32.mrf.mxu0  ;;  %v3304_v27 = vpack.c.bf16 %v3131_v14, %v3131_v14 }
 0xcb8   :  { %v3133_v13 = vpop.f32.mrf.mxu1 }
 0xcb9   :  { %v4825_v33 = vpop.f32.mrf.mxu0 }
 0xcba   :  { %v4833_v50 = vpop.f32.mrf.mxu1 }
 0xcbb   :  { %v3173_v55 = vpop.f32.mrf.mxu0 }
 0xcbc   :  { %v3174_v56 = vadd.f32 %v5753_v45, %v3173_v55  ;;  %v3213_v35 = vpop.f32.mrf.mxu1  ;;  %v3011_v45 = vadd.f32 %v5769_v53, %v3010_v37 }
 0xcbd   :  { %v3214_v57 = vadd.f32 %v5758_v3, %v3213_v35  ;;  %v4840_v60 = vpop.f32.mrf.mxu0  ;;  %v3051_v3 = vadd.f32 %v5774_v54, %v3050_v39 }
 0xcbe   :  { %v5991_v17 = vpack.c.bf16 %v3174_v56, %v3174_v56  ;;  %v4848_v23 = vpop.f32.mrf.mxu1  ;;  %v3301_v2 = vpack.c.bf16 %v3011_v45, %v3011_v45 }
 0xcbf   :  { %v5993_v31 = vpack.c.bf16 %v3214_v57, %v3214_v57  ;;  %v3176_v29 = vpop.f32.mrf.mxu0  ;;  %v3302_v53 = vpack.c.bf16 %v3051_v3, %v3051_v3 }
 0xcc0   :  { %v3313_v36 = vsel %vm343_vm2, %v5991_v17, 0  ;;  %v3216_v38 = vpop.f32.mrf.mxu1 }
 0xcc1   :  { %v3359_v40 = vsel %vm343_vm2, %v5993_v31, 0  ;;  %v4841_v44 = vpop.f32.mrf.mxu0  ;;  %4867 = vmatpush3.bf16.xpose.msra.mxu0 %v3313_v36 }
 0xcc2   :  { %v4849_v30 = vpop.f32.mrf.mxu1  ;;  %4873 = vmatpush3.bf16.xpose.msra.mxu1 %v3359_v40  ;;  %4878 = vmatprep.subr.bf16.mxu0 %v5095_v1 }
 0xcc3   :  { %v3253_v18 = vpop.f32.mrf.mxu0  ;;  %4884 = vmatprep.subr.bf16.mxu1 %v5095_v1 }
 0xcc4   :  { %v3254_v22 = vadd.f32 %v5783_v58, %v3253_v18  ;;  %v3293_v46 = vpop.f32.mrf.mxu1 }
 0xcc5   :  { %v3294_v47 = vadd.f32 %v5788_v59, %v3293_v46  ;;  %v4856_v0 = vpop.f32.mrf.mxu0  ;;  %v3091_v59 = vadd.f32 %v5803_v15, %v3090_v61  ;;  %v4259_v15 = vld [vmem:[%s6202_s24 + $0x8] sm:$0xff] }
 0xcc6   :  { %v6005_v4 = vpack.c.bf16 %v3254_v22, %v3254_v22  ;;  %v4864_v5 = vpop.f32.mrf.mxu1 }
 0xcc7   :  { %v6007_v7 = vpack.c.bf16 %v3294_v47, %v3294_v47  ;;  %v3256_v8 = vpop.f32.mrf.mxu0  ;;  %v3303_v25 = vpack.c.bf16 %v3091_v59, %v3091_v59 }
 0xcc8   :  { %v3405_v54 = vsel %vm343_vm2, %v6005_v4, 0  ;;  %v3296_v51 = vpop.f32.mrf.mxu1  ;;  %4869 = vmatmul.mubr.msk.bf16.vlgmr.msra.gmra.mxu0 %vm343_vm2, %v3301_v2 }
 0xcc9   :  { %v3451_v58 = vsel %vm343_vm2, %v6007_v7, 0  ;;  %v4857_v32 = vpop.f32.mrf.mxu0  ;;  %4875 = vmatmul.mubr.msk.bf16.vlgmr.msra.gmra.mxu1 %vm343_vm2, %v3302_v53  ;;  %4879 = vmatpush3.bf16.xpose.msra.mxu0 %v3405_v54 }
 0xcca   :  { %v4865_v6 = vpop.f32.mrf.mxu1  ;;  %4885 = vmatpush3.bf16.xpose.msra.mxu1 %v3451_v58  ;;  %4880 = vmatprep.mubr.msk.bf16.mxu0 %vm5096_vm0, %v5095_v1  ;;  %v6053_v32 = vld [vmem:[%s6180_s13] ss:$0 sm:$0xff] }
 0xccb   :  { %4886 = vmatprep.mubr.msk.bf16.mxu1 %vm5096_vm0, %v5095_v1  ;;  %4890 = vmatprep.subr.bf16.mxu0 %v5095_v1  ;;  %v2970_v59 = vadd.f32 %v6053_v32, %v5987_v20 }
 0xccc   :  { %4896 = vmatprep.subr.bf16.mxu1 %v5095_v1 }
 0xccd   :  { %v3921_v6 = vadd.f32 %v2970_v59, %v5629_v43 }
 0xccf   :  { %v3923_v14 = vsel %vm135_vm1, %v3921_v6, 0.0 }
 0xcd0   :  { %4881 = vmatmul.mubr.msk.bf16.vlgmr.msra.gmra.mxu0 %vm343_vm2, %v3303_v25 }
 0xcd1   :  { %4887 = vmatmul.mubr.msk.bf16.vlgmr.msra.gmra.mxu1 %vm343_vm2, %v3304_v27  ;;  %4892 = vmatprep.mubr.msk.bf16.mxu0 %vm5096_vm0, %v5095_v1 }
 0xcd2   :  { %4898 = vmatprep.mubr.msk.bf16.mxu1 %vm5096_vm0, %v5095_v1 }
 0xd88   :  { %v3349_v16 = vpop.f32.mrf.mxu0 }
 0xd89   :  { %v3350_v28 = vadd.f32 %v4259_v15, %v3349_v16  ;;  %v3395_v34 = vpop.f32.mrf.mxu1 }
 0xd8a   :  { %v4870_v37 = vpop.f32.mrf.mxu0  ;;  %v3396_v39 = vadd.f32 %v4259_v15, %v3395_v34 }
 0xd8b   :  { %v4876_v11 = vpop.f32.mrf.mxu1  ;;  %v3493_v12 = vsel %vm343_vm2, %v3350_v28, -inf }
 0xd8c   :  { %3494 = vmax.xlane.f32.xlu0 %v3493_v12  ;;  %v3352_v26 = vpop.f32.mrf.mxu0  ;;  %v3496_v61 = vsel %vm343_vm2, %v3396_v39, -inf }
 0xd8d   :  { %v3398_v52 = vpop.f32.mrf.mxu1 }
 0xd8e   :  { %v4871_v41 = vpop.f32.mrf.mxu0 }
 0xd8f   :  { %v4877_v42 = vpop.f32.mrf.mxu1 }
 0xd90   :  { %3497 = vmax.xlane.f32.xlu0 %v3496_v61  ;;  %v3441_v9 = vpop.f32.mrf.mxu0 }
 0xd91   :  { %v3442_v48 = vadd.f32 %v4259_v15, %v3441_v9  ;;  %v3487_v10 = vpop.f32.mrf.mxu1 }
 0xd92   :  { %v3488_v49 = vadd.f32 %v4259_v15, %v3487_v10  ;;  %v4882_v13 = vpop.f32.mrf.mxu0 }
 0xd93   :  { %v4888_v33 = vpop.f32.mrf.mxu1  ;;  %v3499_v50 = vsel %vm343_vm2, %v3442_v48, -inf }
 0xd94   :  { %3500 = vmax.xlane.f32.xlu1 %v3499_v50  ;;  %v3444_v55 = vpop.f32.mrf.mxu0  ;;  %v3502_v56 = vsel %vm343_vm2, %v3488_v49, -inf }
 0xd95   :  { %v3490_v35 = vpop.f32.mrf.mxu1  ;;  %3503 = vmax.xlane.f32.xlu0 %v3502_v56 }
 0xd96   :  { %v4883_v57 = vpop.f32.mrf.mxu0 }
 0xd97   :  { %v4889_v60 = vpop.f32.mrf.mxu1 }
 0xda5   :  { %3542 = vrot.lane.b32.xlu1 %v5991_v17, %s5097_s28 }
 0xe15   :  { %v3495_v23 = vpop.xlane.xlu0 %3494 }
 0xe16   :  { %v3505_v29 = vsub.f32 %v3350_v28, %v3495_v23 }
 0xe18   :  { %v3509_v36 = vmul.f32 1.442695, %v3505_v29 }
 0xe19   :  { %v3498_v38 = vpop.xlane.xlu0 %3497 }
 0xe1a   :  { %5047 = vpow2.f32 %v3509_v36  ;;  %v3506_v40 = vsub.f32 %v3396_v39, %v3498_v38 }
 0xe1c   :  { %v3511_v44 = vmul.f32 1.442695, %v3506_v40 }
 0xe1d   :  { %v3501_v45 = vpop.xlane.xlu1 %3500 }
 0xe1e   :  { %5049 = vpow2.f32 %v3511_v44  ;;  %v3507_v30 = vsub.f32 %v3442_v48, %v3501_v45  ;;  %v3504_v3 = vpop.xlane.xlu0 %3503 }
 0xe1f   :  { %v3508_v18 = vsub.f32 %v3488_v49, %v3504_v3 }
 0xe20   :  { %v3513_v22 = vmul.f32 1.442695, %v3507_v30 }
 0xe21   :  { %v3515_v46 = vmul.f32 1.442695, %v3508_v18  ;;  %v3543_v47 = vpop.permute.xlu1 %3542 }
 0xe22   :  { %5051 = vpow2.f32 %v3513_v22  ;;  %v3548_v0 = vsel %vm590_vm3, %v3543_v47, 0 }
 0xe23   :  { %5053 = vpow2.f32 %v3515_v46  ;;  %4891 = vmatpush3.bf16.msra.mxu0 %v3548_v0 }
 0xe24   :  { %4902 = vmatprep.subr.bf16.mxu0 %v5095_v1 }
 0xe27   :  { %v5048_v17 = vpop.eup %5047 }
 0xe28   :  { %v3517_v2 = vsel %vm343_vm2, %v5048_v17, 0.0 }
 0xe29   :  { %3518 = vadd.xlane.f32.xlu1 %v3517_v2 }
 0xe2b   :  { %v5050_v5 = vpop.eup %5049 }
 0xe2c   :  { %v3520_v53 = vsel %vm343_vm2, %v5050_v5, 0.0 }
 0xe2d   :  { %3521 = vadd.xlane.f32.xlu0 %v3520_v53 }
 0xe2f   :  { %v5052_v8 = vpop.eup %5051 }
 0xe30   :  { %v5054_v54 = vpop.eup %5053  ;;  %v3523_v51 = vsel %vm343_vm2, %v5052_v8, 0.0 }
 0xe31   :  { %3524 = vadd.xlane.f32.xlu1 %v3523_v51  ;;  %v3526_v58 = vsel %vm343_vm2, %v5054_v54, 0.0 }
 0xe32   :  { %3527 = vadd.xlane.f32.xlu0 %v3526_v58 }
 0xe42   :  { %3640 = vrot.lane.b32.xlu1 %v6005_v4, %s5097_s28 }
 0xe46   :  { %3689 = vrot.lane.b32.xlu1 %v6007_v7, %s5097_s28 }
 0xe48   :  { %3591 = vrot.lane.b32.xlu0 %v5993_v31, %s5097_s28 }
 0xe67   :  { %3924 = vadd.xlane.f32.xlu0 %v3923_v14 }
 0xeb2   :  { %v3519_v4 = vpop.xlane.xlu1 %3518 }
 0xeb3   :  { %5055 = vrcp.f32 %v3519_v4 }
 0xeb6   :  { %v3522_v25 = vpop.xlane.xlu0 %3521 }
 0xeb7   :  { %5057 = vrcp.f32 %v3522_v25 }
 0xeba   :  { %v3525_v7 = vpop.xlane.xlu1 %3524 }
 0xebb   :  { %5059 = vrcp.f32 %v3525_v7  ;;  %v3528_v31 = vpop.xlane.xlu0 %3527 }
 0xebc   :  { %5061 = vrcp.f32 %v3528_v31 }
 0xebe   :  { %v3641_v16 = vpop.permute.xlu1 %3640 }
 0xebf   :  { %v3592_v27 = vpop.permute.xlu0 %3591  ;;  %v3646_v39 = vsel %vm590_vm3, %v3641_v16, 0 }
 0xec0   :  { %v5056_v15 = vpop.eup %5055  ;;  %v3597_v28 = vsel %vm590_vm3, %v3592_v27, 0 }
 0xec1   :  { %v3533_v34 = vmul.f32 %v5056_v15, %v5048_v17  ;;  %4897 = vmatpush3.bf16.msra.mxu1 %v3597_v28 }
 0xec2   :  { %4908 = vmatprep.subr.bf16.mxu1 %v5095_v1  ;;  %v3690_v11 = vpop.permute.xlu1 %3689 }
 0xec3   :  { %v3537_v43 = vpack.c.bf16 %v3533_v34, %v3533_v34  ;;  %v3695_v42 = vsel %vm590_vm3, %v3690_v11, 0 }
 0xec4   :  { %v5058_v20 = vpop.eup %5057 }
 0xec5   :  { %v3534_v37 = vmul.f32 %v5058_v20, %v5050_v5  ;;  %4893 = vmatmul.mubr.msk.bf16.vlgmr.msra.gmra.mxu0 %vm343_vm2, %v3537_v43 }
 0xec6   :  { %4903 = vmatpush3.bf16.msra.mxu0 %v3646_v39  ;;  %4904 = vmatprep.mubr.msk.bf16.mxu0 %vm5096_vm0, %v5095_v1 }
 0xec7   :  { %v3538_v12 = vpack.c.bf16 %v3534_v37, %v3534_v37  ;;  %4914 = vmatprep.subr.bf16.mxu0 %v5095_v1 }
 0xec8   :  { %v5060_v26 = vpop.eup %5059 }
 0xec9   :  { %v5062_v52 = vpop.eup %5061  ;;  %v3535_v41 = vmul.f32 %v5060_v26, %v5052_v8  ;;  %4899 = vmatmul.mubr.msk.bf16.vlgmr.msra.gmra.mxu1 %vm343_vm2, %v3538_v12 }
 0xeca   :  { %4909 = vmatpush3.bf16.msra.mxu1 %v3695_v42  ;;  %4910 = vmatprep.mubr.msk.bf16.mxu1 %vm5096_vm0, %v5095_v1  ;;  %v3536_v9 = vmul.f32 %v5062_v52, %v5054_v54 }
 0xecb   :  { %v3539_v61 = vpack.c.bf16 %v3535_v41, %v3535_v41  ;;  %4920 = vmatprep.subr.bf16.mxu1 %v5095_v1  ;;  %v4989_v41 = vld [vmem:[%s6181_s14 + $0x8] sm:$0xff]  }
 0xecc   :  { %v3540_v48 = vpack.c.bf16 %v3536_v9, %v3536_v9 }
 0xecd   :  { %4905 = vmatmul.mubr.msk.bf16.vlgmr.msra.gmra.mxu0 %vm343_vm2, %v3539_v61 }
 0xece   :  { %4915 = vmatpush3.bf16.msra.mxu0 %v5878_v63  ;;  %4916 = vmatprep.mubr.msk.bf16.mxu0 %vm5096_vm0, %v5095_v1 }
 0xecf   :  { %4926 = vmatprep.subr.bf16.mxu0 %v5095_v1 }
 0xed1   :  { %4911 = vmatmul.mubr.msk.bf16.vlgmr.msra.gmra.mxu1 %vm343_vm2, %v3540_v48 }
 0xed2   :  { %4921 = vmatpush3.bf16.msra.mxu1 %v5886_v19  ;;  %4922 = vmatprep.mubr.msk.bf16.mxu1 %vm5096_vm0, %v5095_v1 }
 0xed3   :  { %4932 = vmatprep.subr.bf16.mxu1 %v5095_v1 }
 0xef0   :  { %v3925_v10 = vpop.xlane.xlu0 %3924 }
 0xef1   :  { %v3929_v49 = vmul.f32 0.03125, %v3925_v10 }
 0xef3   :  { %v6081_v13 = vsub.f32 %v3921_v6, %v3929_v49 }
 0xef5   :  { %v3933_v63 = vmul.f32 %v6081_v13, %v6081_v13 }
 0xef7   :  { %v3935_v33 = vsel %vm135_vm1, %v3933_v63, 0.0 }
 0xef8   :  { %3936 = vadd.xlane.f32.xlu0 %v3935_v33 }
 0xf81   :  { %v3937_v42 = vpop.xlane.xlu0 %3936 }
 0xf82   :  { %v3941_v61 = vmul.f32 0.03125, %v3937_v42 }
 0xf84   :  { %v3943_v9 = vadd.f32 1e-05, %v3941_v61 }
 0xf85   :  { %v3584_v50 = vpop.f32.mrf.mxu0 }
 0xf86   :  { %v3737_v55 = vpack.c.bf16 %v3584_v50, %v3584_v50  ;;  %5063 = vrsqrt.f32 %v3943_v9 }
 0xf87   :  { %v4894_v56 = vpop.f32.mrf.mxu0 }
 0xf88   :  { %4917 = vmatmul.mubr.msk.bf16.vlgmr.msra.gmra.mxu0 %vm343_vm2, %v3737_v55  ;;  %v6125_v55 = vld [vmem:[%s6185_s18] ss:$0 sm:$0xff] }
 0xf89   :  { %v3587_v19 = vpop.f32.mrf.mxu0  ;;  %v3633_v35 = vpop.f32.mrf.mxu1  ;;  %4927 = vmatpush3.bf16.msra.mxu0 %v5894_v24  ;;  %4928 = vmatprep.mubr.msk.bf16.mxu0 %vm5096_vm0, %v5095_v1 }
 0xf8a   :  { %v3738_v57 = vpack.c.bf16 %v3633_v35, %v3633_v35  ;;  %4938 = vmatprep.subr.bf16.mxu0 %v5095_v1 }
 0xf8b   :  { %v4895_v60 = vpop.f32.mrf.mxu0  ;;  %v4900_v23 = vpop.f32.mrf.mxu1 }
 0xf8c   :  { %4923 = vmatmul.mubr.msk.bf16.vlgmr.msra.gmra.mxu1 %vm343_vm2, %v3738_v57  ;;  %v6132_v57 = vld [vmem:[%s6186_s19] ss:$0 sm:$0xff] }
 0xf8d   :  { %v3636_v29 = vpop.f32.mrf.mxu1  ;;  %v3682_v36 = vpop.f32.mrf.mxu0  ;;  %4933 = vmatpush3.bf16.msra.mxu1 %v5904_v21  ;;  %4934 = vmatprep.mubr.msk.bf16.mxu1 %vm5096_vm0, %v5095_v1 }
 0xf8e   :  { %v3739_v38 = vpack.c.bf16 %v3682_v36, %v3682_v36  ;;  %4946 = vmatprep.subr.bf16.mxu1 %v5095_v1  ;;  %v4992_v29 = vld [vmem:[%s6183_s16 + $0x10] sm:$0xff]   ;;  %v4993_v36 = vld [vmem:[%s6183_s16 + $0x8] sm:$0xff]  }
 0xf8f   :  { %v4901_v24 = vpop.f32.mrf.mxu1  ;;  %v4906_v40 = vpop.f32.mrf.mxu0 }
 0xf90   :  { %4929 = vmatmul.mubr.msk.bf16.vlgmr.msra.gmra.mxu0 %vm343_vm2, %v3739_v38  ;;  %v4994_v38 = vld [vmem:[%s6183_s16] sm:$0xff]  }
 0xf91   :  { %v3685_v44 = vpop.f32.mrf.mxu0  ;;  %v3731_v45 = vpop.f32.mrf.mxu1  ;;  %4942 = vmatprep.mubr.msk.bf16.mxu0 %vm5096_vm0, %v5095_v1  ;;  %4939 = vmatpush3.bf16.msra.mxu0 %v4989_v41  ;;  %v4272_v24 = vld [vmem:[%s6182_s15] ss:$0 sm:$0xff]  ;;  %s5099_s15 = smov [#allocation2]  }
 0xf92   :  { %v3740_v30 = vpack.c.bf16 %v3731_v45, %v3731_v45  ;;  %4940 = vmatprep.subr.bf16.mxu0 %v5095_v1 }
 0xf93   :  { %v4907_v3 = vpop.f32.mrf.mxu0  ;;  %v4912_v18 = vpop.f32.mrf.mxu1 }
 0xf94   :  { %4935 = vmatmul.mubr.msk.bf16.vlgmr.msra.gmra.mxu1 %vm343_vm2, %v3740_v30  ;;  %v5064_v63 = vpop.eup %5063 }
 0xf95   :  { %v3734_v21 = vpop.f32.mrf.mxu1  ;;  %4954 = vmatprep.mubr.msk.bf16.mxu1 %vm5096_vm0, %v5095_v1  ;;  %v3947_v33 = vmul.f32 %v5064_v63, %v6081_v13 }
 0xf97   :  { %v4913_v22 = vpop.f32.mrf.mxu1  ;;  %v3949_v56 = vmul.f32 %v6125_v55, %v3947_v33 }
 0xf99   :  { %v3951_v60 = vadd.f32 %v6132_v57, %v3949_v56 }
0x1048   :  { %v3778_v46 = vpop.f32.mrf.mxu0 }
0x1049   :  { %v3913_v51 = vsel %vm135_vm1, %v3778_v46, 0.0 }
0x104a   :  { %v4918_v47 = vpop.f32.mrf.mxu0 }
0x104c   :  { %v3781_v0 = vpop.f32.mrf.mxu0  ;;  %v3821_v17 = vpop.f32.mrf.mxu1 }
0x104d   :  { %v3914_v53 = vsel %vm135_vm1, %v3821_v17, 0.0 }
0x104e   :  { %v4919_v2 = vpop.f32.mrf.mxu0  ;;  %v4924_v5 = vpop.f32.mrf.mxu1  ;;  %v3915_v59 = vadd.f32 %v3914_v53, %v3913_v51 }
0x1050   :  { %v3824_v8 = vpop.f32.mrf.mxu1  ;;  %v3864_v54 = vpop.f32.mrf.mxu0 }
0x1051   :  { %v3916_v58 = vsel %vm135_vm1, %v3864_v54, 0.0 }
0x1052   :  { %v4925_v6 = vpop.f32.mrf.mxu1  ;;  %v4930_v14 = vpop.f32.mrf.mxu0  ;;  %v3917_v4 = vadd.f32 %v3916_v58, %v3915_v59 }
0x1054   :  { %v3867_v25 = vpop.f32.mrf.mxu0  ;;  %v3907_v7 = vpop.f32.mrf.mxu1 }
0x1055   :  { %v3918_v31 = vsel %vm135_vm1, %v3907_v7, 0.0 }
0x1056   :  { %v3919_v27 = vadd.f32 %v3918_v31, %v3917_v4  ;;  %v4931_v15 = vpop.f32.mrf.mxu0  ;;  %v4936_v16 = vpop.f32.mrf.mxu1 }
0x1058   :  { %v3920_v28 = vadd.f32 %v6053_v32, %v3919_v27  ;;  %v3910_v34 = vpop.f32.mrf.mxu1  ;;  %v4990_v32 = vld [vmem:[%s6181_s14] sm:$0xff]  }
0x1059   :  { %4941 = vmatpush3.bf16.msra.mxu0 %v4990_v32 }
0x105a   :  { %v4937_v43 = vpop.f32.mrf.mxu1  ;;  %v3922_v20 = vadd.f32 %v3920_v28, %v5925_v62  ;;  %v4991_v62 = vld [vmem:[%s6183_s16 + $0x18] sm:$0xff]   ;;  %s4147_s16 = sshll.u32 %s5099_s15, 4  ;;  %s4148_s16 = int_to_ptr.vmem [resolvable:$true] %s4147_s16 }
0x105b   :  { %4947 = vmatpush3.bf16.msra.mxu1 %v4991_v62  ;;  %p5078_p1 = scmp.lt.s32.totalorder %s4148_s16, %s4148_s16 }
0x105c   :  { %v3926_v37 = vsel %vm135_vm1, %v3922_v20, 0.0  ;;  %4948 = vmatprep.subr.bf16.mxu1 %v5095_v1 }
0x105d   :  { %3927 = vadd.xlane.f32.xlu1 %v3926_v37 }
0x105f   :  { %4949 = vmatpush3.bf16.msra.mxu1 %v4992_v29 }
0x1060   :  { %4950 = vmatprep.subr.bf16.mxu1 %v5095_v1 }
0x1063   :  { %4951 = vmatpush3.bf16.msra.mxu1 %v4993_v36 }
0x1064   :  { %4952 = vmatprep.subr.bf16.mxu1 %v5095_v1  ;;  %v4276_v1 = vld [vmem:[%s6184_s17] ss:$0 sm:$0xff]  ;;  %s5073_s17 = scalar_lea.vmem %s4148_s16, 256 }
0x1065   :  { %p5074_p0 = scmp.ne.s32.totalorder %s4148_s16, %s5073_s17  ;;  %p5079_p2 = scmp.lt.s32.totalorder %s5073_s17, %s5073_s17 }
0x1067   :  { %4953 = vmatpush3.bf16.msra.mxu1 %v4994_v38  ;;  %p5080_p3 = por %p5079_p2, %p5078_p1 }
0x1069   :  { %p5081_p4 = pnand %p5080_p3, %p5074_p0 }
0x10e6   :  { %v3928_v39 = vpop.xlane.xlu1 %3927 }
0x10e7   :  { %v3930_v11 = vmul.f32 0.03125, %v3928_v39 }
0x10e9   :  { %v3932_v12 = vsub.f32 %v3922_v20, %v3930_v11 }
0x10eb   :  { %v3934_v26 = vmul.f32 %v3932_v12, %v3932_v12 }
0x10ed   :  { %v3938_v52 = vsel %vm135_vm1, %v3934_v26, 0.0 }
0x10ee   :  { %3939 = vadd.xlane.f32.xlu0 %v3938_v52 }
0x1177   :  { %v3940_v48 = vpop.xlane.xlu0 %3939 }
0x1178   :  { %v3942_v10 = vmul.f32 0.03125, %v3940_v48 }
0x117a   :  { %v3944_v49 = vadd.f32 1e-05, %v3942_v10 }
0x117c   :  { %5065 = vrsqrt.f32 %v3944_v49 }
0x1189   :  { %v5066_v50 = vpop.eup %5065 }
0x118a   :  { %v3948_v19 = vmul.f32 %v5066_v50, %v3932_v12 }
0x118c   :  { %v3950_v35 = vmul.f32 %v6125_v55, %v3948_v19 }
0x118e   :  { %v3952_v13 = vadd.f32 %v6132_v57, %v3950_v35 }
0x1190   :  { %v3953_v23 = vpack.c.bf16 %v3952_v13, %v3951_v60 }
0x1192   :  { %4943 = vmatmul.mubr.msk.bf16.vlgmr.msra.gmra.mxu0 %vm135_vm1, %v3953_v23 }
0x1252   :  { %v4014_v40 = vpop.f32.mrf.mxu0 }
0x1253   :  { %v4015_v45 = vadd.f32 %v4272_v24, %v4014_v40 }
0x1254   :  { %v4944_v44 = vpop.f32.mrf.mxu0 }
0x1255   :  { %v4021_v21 = vmax.f32 %v4015_v45, 0.0 }
0x1256   :  { %v4017_v30 = vpop.f32.mrf.mxu0 }
0x1257   :  { %v4018_v3 = vadd.f32 %v4272_v24, %v4017_v30 }
0x1258   :  { %v4945_v18 = vpop.f32.mrf.mxu0 }
0x1259   :  { %v4022_v22 = vmax.f32 %v4018_v3, 0.0 }
0x125b   :  { %v4023_v46 = vpack.c.bf16 %v4022_v22, %v4021_v21 }
0x125d   :  { %4955 = vmatmul.mubr.msk.bf16.vlgmr.msra.gmra.mxu1 %vm4063_vm4, %v4023_v46 }
0x131d   :  { %v4101_v47 = vpop.f32.mrf.mxu1 }
0x131e   :  { %v4102_v0 = vadd.f32 %v4276_v1, %v4101_v47 }
0x131f   :  { %v4956_v17 = vpop.f32.mrf.mxu1 }
0x1320   :  { %v4108_v2 = vadd.f32 %v4102_v0, %v3951_v60 }
0x1321   :  { %v4104_v5 = vpop.f32.mrf.mxu1 }
0x1322   :  { %v4105_v53 = vadd.f32 %v4276_v1, %v4104_v5  ;;  %v4110_v8 = vsel %vm135_vm1, %v4108_v2, 0.0 }
0x1323   :  { %4111 = vadd.xlane.f32.xlu1 %v4110_v8  ;;  %v4957_v54 = vpop.f32.mrf.mxu1 }
0x1324   :  { %v4109_v51 = vadd.f32 %v4105_v53, %v3952_v13 }
0x1326   :  { %v4113_v58 = vsel %vm135_vm1, %v4109_v51, 0.0 }
0x1327   :  { %4114 = vadd.xlane.f32.xlu0 %v4113_v58 }
0x13ac   :  { %v4112_v59 = vpop.xlane.xlu1 %4111 }
0x13ad   :  { %v4116_v6 = vmul.f32 0.03125, %v4112_v59 }
0x13af   :  { %v4118_v14 = vsub.f32 %v4108_v2, %v4116_v6 }
0x13b0   :  { %v4115_v4 = vpop.xlane.xlu0 %4114 }
0x13b1   :  { %v4117_v25 = vmul.f32 0.03125, %v4115_v4  ;;  %v4120_v7 = vmul.f32 %v4118_v14, %v4118_v14 }
0x13b3   :  { %v4119_v31 = vsub.f32 %v4109_v51, %v4117_v25  ;;  %v4122_v27 = vsel %vm135_vm1, %v4120_v7, 0.0 }
0x13b4   :  { %4123 = vadd.xlane.f32.xlu1 %v4122_v27 }
0x13b5   :  { %v4121_v15 = vmul.f32 %v4119_v31, %v4119_v31 }
0x13b7   :  { %v4125_v16 = vsel %vm135_vm1, %v4121_v15, 0.0 }
0x13b8   :  { %4126 = vadd.xlane.f32.xlu0 %v4125_v16 }
0x143d   :  { %v4124_v28 = vpop.xlane.xlu1 %4123 }
0x143e   :  { %v4128_v34 = vmul.f32 0.03125, %v4124_v28 }
0x1440   :  { %v4130_v43 = vadd.f32 1e-05, %v4128_v34 }
0x1441   :  { %v4127_v20 = vpop.xlane.xlu0 %4126 }
0x1442   :  { %5067 = vrsqrt.f32 %v4130_v43  ;;  %v4129_v37 = vmul.f32 0.03125, %v4127_v20 }
0x1444   :  { %v4131_v39 = vadd.f32 1e-05, %v4129_v37 }
0x1446   :  { %5069 = vrsqrt.f32 %v4131_v39 }
0x144f   :  { %v5068_v11 = vpop.eup %5067 }
0x1450   :  { %v4134_v12 = vmul.f32 %v5068_v11, %v4118_v14 }
0x1452   :  { %v4136_v26 = vmul.f32 %v6125_v55, %v4134_v12 }
0x1453   :  { %v5070_v52 = vpop.eup %5069 }
0x1454   :  { %v4135_v41 = vmul.f32 %v5070_v52, %v4119_v31  ;;  %v4138_v32 = vadd.f32 %v6132_v57, %v4136_v26 }
0x1456   :  { %v4137_v62 = vmul.f32 %v6125_v55, %v4135_v41  ;;  %4140 = vst.msk [vmem:[#allocation2] sm:$0xff] %vm135_vm1, %v4138_v32 }
0x1458   :  { %v4139_v42 = vadd.f32 %v6132_v57, %v4137_v62 }
0x145a   :  { %4141 = vst.msk [vmem:[#allocation2 + $0x8] sm:$0xff] %vm135_vm1, %v4139_v42 }
0x145b   :  { %5084 = shalt.err (!%p5081_p4)
}
0x145c   :  { %s5100_s27 = smov 128   ;;  %s5101_s12 = smov 8  }
0x145d   :  { %4153 = dma.vmem_to_hbm [thread:$0]  %s4148_s16, 256, %s6187_s20, [#allocation3], %s5100_s27, %s5100_s27, %s5101_s12  }
0x145e   :  { %5093 = dma.done.wait [#allocation3], 256  }
0x145f   :  { %5094 = vsyncadd [#allocation3], 4294967040 }
0x1460   :  { %4157 = vsyncpa [#allocation3], 1 }

</bundles_post_ra>
